<compile_context>
chip_gen: v7x
topology: tpu7x:2x2x1
jax: 0.10.0
libtpu: 0.0.40
codegen_flags: <defaults>
</compile_context>

<pallas_src>
import math

import jax
import jax.numpy as jnp
from jax.experimental import pallas as pl
from jax.experimental.pallas import tpu as pltpu

LANE = 128  # TPU lane width: channel dims are padded to this.


def _round_up(x, m):
    return (x + m - 1) // m * m


def _conv_bn_relu_kernel(x_hbm, w_ref, b_ref, o_ref, xbuf, sem):
    # x_hbm : (N, H+2, Wp, Cin_p) bf16, HBM (zero halo + channel pad)
    # w_ref : (9*Cin_p, Cout_p)   bf16, BN-scale folded, (kh, kw, cin) ordering
    # b_ref : (1, Cout_p)         f32 folded BN bias
    # o_ref : (1, TH, W, Cout_p)  f32 output row-tile
    # xbuf  : (2, TH+2, Wp, Cin_p) bf16 VMEM double buffer
    # sem   : (2,) DMA semaphores
    n = pl.program_id(0)
    t = pl.program_id(1)
    num_t = pl.num_programs(1)

    TH = o_ref.shape[1]
    W = o_ref.shape[2]
    Cout_p = o_ref.shape[3]
    Cin_p = xbuf.shape[3]

    def copy_in(tt, slot):
        return pltpu.make_async_copy(
            x_hbm.at[n, pl.ds(tt * TH, TH + 2)], xbuf.at[slot], sem.at[slot])

    slot = t & 1

    # Prime the pipeline at the first row-tile of each batch element.
    @pl.when(t == 0)
    def _():
        copy_in(0, 0).start()

    copy_in(t, slot).wait()

    # Prefetch the next row tile of this batch element into the other buffer.
    @pl.when(t + 1 < num_t)
    def _():
        copy_in(t + 1, 1 - slot).start()

    xw = xbuf[slot]  # (TH+2, Wp, Cin_p) bf16

    # im2col: 9 shifted windows -> one (TH*W, 9*Cin_p) patch -> single MXU matmul.
    patch = jnp.concatenate(
        [xw[kh:kh + TH, kw:kw + W, :].reshape(TH * W, Cin_p)
         for kh in range(3) for kw in range(3)],
        axis=1)

    acc = jnp.dot(patch, w_ref[...], preferred_element_type=jnp.float32)
    y = jnp.maximum(acc + b_ref[0], 0.0)  # f32 epilogue: folded-BN bias + ReLU
    o_ref[...] = y.reshape(1, TH, W, Cout_p).astype(o_ref.dtype)


def conv_bn_relu(x_nchw, weight, gamma, beta, running_mean, running_var,
                 eps=1e-5):
    """ConvBnRelu forward. x: (N, Cin, H, W); weight: (Cout, Cin, 3, 3) OIHW."""
    N, Cin, H, W = x_nchw.shape
    Cout = weight.shape[0]
    Cin_p = _round_up(Cin, LANE)
    Cout_p = _round_up(Cout, LANE)
    Wp = _round_up(W + 2, 8)  # sublane-aligned padded width

    # Row-tile height: keep >=2 tiles per image when possible (pipelining / v7x
    # VMEM) and TH*W a decent MXU M dimension.
    TH = H
    for cand in (32, 16, 8, 4, 2):
        if H % cand == 0 and H // cand >= 2:
            TH = cand
            break
    HT = H // TH

    # ---- parameter prep (done once per weight set; constant-folded by XLA) ----
    scale = gamma * jax.lax.rsqrt(running_var + eps)        # (Cout,)
    bias = beta - running_mean * scale                      # (Cout,)
    w_hwio = jnp.transpose(weight, (2, 3, 1, 0)) * scale    # (3,3,Cin,Cout), BN folded
    w_p = jnp.zeros((3, 3, Cin_p, Cout_p), jnp.float32)
    w_p = w_p.at[:, :, :Cin, :Cout].set(w_hwio)
    w_p = w_p.reshape(9 * Cin_p, Cout_p).astype(jnp.bfloat16)
    b_p = jnp.zeros((1, Cout_p), jnp.float32).at[0, :Cout].set(bias)

    # ---- activation layout: NCHW -> NHWC, halo + channel pad, bf16 ----
    # TODO(synk): in a production pipeline keep activations NHWC / channel-padded
    # end-to-end so this transpose+pad HBM round trip disappears from the hot path.
    x_nhwc = jnp.transpose(x_nchw, (0, 2, 3, 1))
    x_p = jnp.pad(x_nhwc, ((0, 0), (1, 1), (1, Wp - W - 1),
                           (0, Cin_p - Cin))).astype(jnp.bfloat16)

    out_p = pl.pallas_call(
        _conv_bn_relu_kernel,
        out_shape=jax.ShapeDtypeStruct((N, H, W, Cout_p), jnp.float32),
        grid=(N, HT),
        in_specs=[
            pl.BlockSpec(memory_space=pl.ANY),                     # input stays in HBM
            pl.BlockSpec((9 * Cin_p, Cout_p), lambda n, t: (0, 0)),
            pl.BlockSpec((1, Cout_p), lambda n, t: (0, 0)),
        ],
        out_specs=pl.BlockSpec((1, TH, W, Cout_p), lambda n, t: (n, t, 0, 0)),
        scratch_shapes=[
            pltpu.VMEM((2, TH + 2, Wp, Cin_p), jnp.bfloat16),
            pltpu.SemaphoreType.DMA((2,)),
        ],
        compiler_params=pltpu.CompilerParams(
            dimension_semantics=("parallel", "arbitrary")),
    )(x_p, w_p, b_p)

    # Slice off channel padding, back to NCHW (PyTorch convention).
    return jnp.transpose(out_p[..., :Cout], (0, 3, 1, 2))


def _reference(x_nchw, weight, gamma, beta, running_mean, running_var,
               eps=1e-5):
    """Pure-JAX f32 reference: conv -> eval-mode BN -> ReLU."""
    dn = jax.lax.conv_dimension_numbers(x_nchw.shape, weight.shape,
                                        ("NCHW", "OIHW", "NCHW"))
    y = jax.lax.conv_general_dilated(x_nchw, weight, (1, 1), ((1, 1), (1, 1)),
                                     dimension_numbers=dn)
    inv = gamma / jnp.sqrt(running_var + eps)
    y = (y - running_mean[None, :, None, None]) * inv[None, :, None, None] \
        + beta[None, :, None, None]
    return jnp.maximum(y, 0.0)


if __name__ == "__main__":
    key = jax.random.PRNGKey(0)
    k1, k2, k3, k4, k5, k6 = jax.random.split(key, 6)

    N, Cin, Cout, H, W, K = 2, 4, 8, 16, 16, 3

    x = jax.random.normal(k1, (N, Cin, H, W), dtype=jnp.float32)
    bound = 1.0 / math.sqrt(Cin * K * K)
    weight = jax.random.uniform(k2, (Cout, Cin, K, K), jnp.float32, -bound, bound)
    gamma = jax.random.uniform(k3, (Cout,), jnp.float32, 0.5, 1.5)
    beta = jax.random.uniform(k4, (Cout,), jnp.float32, -0.5, 0.5)
    running_mean = 0.1 * jax.random.normal(k5, (Cout,), jnp.float32)
    running_var = jax.random.uniform(k6, (Cout,), jnp.float32, 0.5, 1.5)

    out = conv_bn_relu(x, weight, gamma, beta, running_mean, running_var)
    out = jax.block_until_ready(out)

    ref = _reference(x, weight, gamma, beta, running_mean, running_var)
    assert out.shape == (N, Cout, H, W)
    # bf16 MXU operands (per perf review) -> relaxed tolerance vs. f32 reference.
    err = float(jnp.max(jnp.abs(out - ref)))
    assert err < 3e-2, f"max abs err {err}"

    print("KERNEL_OK")
</pallas_src>

<mosaic_0001>
module attributes {stable_mosaic.version = 11 : i64} {
  func.func @_conv_bn_relu_kernel(%arg0: i32, %arg1: i32, %arg2: memref<2x18x24x128xbf16, #tpu.memory_space<any>>, %arg3: memref<1152x128xbf16, #tpu.memory_space<vmem>>, %arg4: memref<1x128xf32, #tpu.memory_space<vmem>>, %arg5: memref<1x8x16x128xf32, #tpu.memory_space<vmem>>, %arg6: memref<2x10x24x128xbf16, #tpu.memory_space<vmem>>, %arg7: memref<2x!tpu.dma_semaphore, #tpu.memory_space<semaphore_mem>>) attributes {dimension_semantics = [#tpu.dimension_semantics<parallel>, #tpu.dimension_semantics<arbitrary>], iteration_bounds = array<i64: 2, 2>, scalar_prefetch = 0 : i64, scratch_operands = 2 : i64, tpu.core_type = #tpu.core_type<tc>, window_params = [{}, {pipeline_mode = #tpu.pipeline_mode<synchronous>, transform_indices = @transform_1, window_bounds = array<i64: 1152, 128>}, {pipeline_mode = #tpu.pipeline_mode<synchronous>, transform_indices = @transform_2, window_bounds = array<i64: 1, 128>}, {transform_indices = @transform_3, window_bounds = array<i64: 1, 8, 16, 128>}]} {
    %c1_i32 = arith.constant 1 : i32
    %0 = arith.andi %arg1, %c1_i32 : i32
    %c0_i32 = arith.constant 0 : i32
    %1 = arith.cmpi eq, %arg1, %c0_i32 : i32
    %2 = arith.extui %1 : i1 to i32
    %c0_i32_0 = arith.constant 0 : i32
    %3 = arith.cmpi ne, %2, %c0_i32_0 : i32
    scf.if %3 {
      %c0_i32_19 = arith.constant 0 : i32
      %c0_i32_20 = arith.constant 0 : i32
      %c0_i32_21 = arith.constant 0 : i32
      %c0_i32_22 = arith.constant 0 : i32
      %c0_i32_23 = arith.constant 0 : i32
      %48 = tpu.memref_slice %arg2[%arg0, %c0_i32_21, %c0_i32_22, %c0_i32_23] : memref<2x18x24x128xbf16, #tpu.memory_space<any>> -> memref<1x10x24x128xbf16, #tpu.memory_space<any>>
      %49 = tpu.memref_squeeze %48 : memref<1x10x24x128xbf16, #tpu.memory_space<any>> -> memref<10x24x128xbf16, #tpu.memory_space<any>>
      %c0_i32_24 = arith.constant 0 : i32
      %c0_i32_25 = arith.constant 0 : i32
      %c0_i32_26 = arith.constant 0 : i32
      %50 = tpu.memref_slice %arg6[%c0_i32_19, %c0_i32_24, %c0_i32_25, %c0_i32_26] : memref<2x10x24x128xbf16, #tpu.memory_space<vmem>> -> memref<1x10x24x128xbf16, #tpu.memory_space<vmem>>
      %51 = tpu.memref_squeeze %50 : memref<1x10x24x128xbf16, #tpu.memory_space<vmem>> -> memref<10x24x128xbf16, #tpu.memory_space<vmem>>
      %52 = tpu.memref_slice %arg7[%c0_i32_20] : memref<2x!tpu.dma_semaphore, #tpu.memory_space<semaphore_mem>> -> memref<1x!tpu.dma_semaphore, #tpu.memory_space<semaphore_mem>>
      %53 = tpu.memref_squeeze %52 : memref<1x!tpu.dma_semaphore, #tpu.memory_space<semaphore_mem>> -> memref<!tpu.dma_semaphore, #tpu.memory_space<semaphore_mem>>
      tpu.enqueue_dma source(%49 : memref<10x24x128xbf16, #tpu.memory_space<any>>) target(%51 : memref<10x24x128xbf16, #tpu.memory_space<vmem>>) target_semaphore(%53 : memref<!tpu.dma_semaphore, #tpu.memory_space<semaphore_mem>>)
    } else {
    }
    %c8_i32 = arith.constant 8 : i32
    %4 = arith.muli %arg1, %c8_i32 : i32
    %c0_i32_1 = arith.constant 0 : i32
    %c0_i32_2 = arith.constant 0 : i32
    %5 = tpu.memref_slice %arg2[%arg0, %4, %c0_i32_1, %c0_i32_2] : memref<2x18x24x128xbf16, #tpu.memory_space<any>> -> memref<1x10x24x128xbf16, #tpu.memory_space<any>>
    %6 = tpu.memref_squeeze %5 : memref<1x10x24x128xbf16, #tpu.memory_space<any>> -> memref<10x24x128xbf16, #tpu.memory_space<any>>
    %c0_i32_3 = arith.constant 0 : i32
    %c0_i32_4 = arith.constant 0 : i32
    %c0_i32_5 = arith.constant 0 : i32
    %7 = tpu.memref_slice %arg6[%0, %c0_i32_3, %c0_i32_4, %c0_i32_5] : memref<2x10x24x128xbf16, #tpu.memory_space<vmem>> -> memref<1x10x24x128xbf16, #tpu.memory_space<vmem>>
    %8 = tpu.memref_squeeze %7 : memref<1x10x24x128xbf16, #tpu.memory_space<vmem>> -> memref<10x24x128xbf16, #tpu.memory_space<vmem>>
    %9 = tpu.memref_slice %arg7[%0] : memref<2x!tpu.dma_semaphore, #tpu.memory_space<semaphore_mem>> -> memref<1x!tpu.dma_semaphore, #tpu.memory_space<semaphore_mem>>
    %10 = tpu.memref_squeeze %9 : memref<1x!tpu.dma_semaphore, #tpu.memory_space<semaphore_mem>> -> memref<!tpu.dma_semaphore, #tpu.memory_space<semaphore_mem>>
    tpu.wait_dma2 semaphore(%10 : memref<!tpu.dma_semaphore, #tpu.memory_space<semaphore_mem>>) src(%6 : memref<10x24x128xbf16, #tpu.memory_space<any>>) dst(%8 : memref<10x24x128xbf16, #tpu.memory_space<vmem>>)
    %c1_i32_6 = arith.constant 1 : i32
    %11 = arith.addi %arg1, %c1_i32_6 : i32
    %c2_i32 = arith.constant 2 : i32
    %12 = arith.cmpi slt, %11, %c2_i32 : i32
    %13 = arith.extui %12 : i1 to i32
    %c0_i32_7 = arith.constant 0 : i32
    %14 = arith.cmpi ne, %13, %c0_i32_7 : i32
    scf.if %14 {
      %c1_i32_19 = arith.constant 1 : i32
      %48 = arith.addi %arg1, %c1_i32_19 : i32
      %c1_i32_20 = arith.constant 1 : i32
      %49 = arith.subi %c1_i32_20, %0 : i32
      %c8_i32_21 = arith.constant 8 : i32
      %50 = arith.muli %48, %c8_i32_21 : i32
      %c0_i32_22 = arith.constant 0 : i32
      %c0_i32_23 = arith.constant 0 : i32
      %51 = tpu.memref_slice %arg2[%arg0, %50, %c0_i32_22, %c0_i32_23] : memref<2x18x24x128xbf16, #tpu.memory_space<any>> -> memref<1x10x24x128xbf16, #tpu.memory_space<any>>
      %52 = tpu.memref_squeeze %51 : memref<1x10x24x128xbf16, #tpu.memory_space<any>> -> memref<10x24x128xbf16, #tpu.memory_space<any>>
      %c0_i32_24 = arith.constant 0 : i32
      %c0_i32_25 = arith.constant 0 : i32
      %c0_i32_26 = arith.constant 0 : i32
      %53 = tpu.memref_slice %arg6[%49, %c0_i32_24, %c0_i32_25, %c0_i32_26] : memref<2x10x24x128xbf16, #tpu.memory_space<vmem>> -> memref<1x10x24x128xbf16, #tpu.memory_space<vmem>>
      %54 = tpu.memref_squeeze %53 : memref<1x10x24x128xbf16, #tpu.memory_space<vmem>> -> memref<10x24x128xbf16, #tpu.memory_space<vmem>>
      %55 = tpu.memref_slice %arg7[%49] : memref<2x!tpu.dma_semaphore, #tpu.memory_space<semaphore_mem>> -> memref<1x!tpu.dma_semaphore, #tpu.memory_space<semaphore_mem>>
      %56 = tpu.memref_squeeze %55 : memref<1x!tpu.dma_semaphore, #tpu.memory_space<semaphore_mem>> -> memref<!tpu.dma_semaphore, #tpu.memory_space<semaphore_mem>>
      tpu.enqueue_dma source(%52 : memref<10x24x128xbf16, #tpu.memory_space<any>>) target(%54 : memref<10x24x128xbf16, #tpu.memory_space<vmem>>) target_semaphore(%56 : memref<!tpu.dma_semaphore, #tpu.memory_space<semaphore_mem>>)
    } else {
    }
    %15 = arith.index_cast %0 : i32 to index
    %c0 = arith.constant 0 : index
    %c0_8 = arith.constant 0 : index
    %c0_9 = arith.constant 0 : index
    %16 = vector.load %arg6[%15, %c0, %c0_8, %c0_9] : memref<2x10x24x128xbf16, #tpu.memory_space<vmem>>, vector<1x10x24x128xbf16>
    %17 = vector.shape_cast %16 : vector<1x10x24x128xbf16> to vector<10x24x128xbf16>
    %18 = vector.extract_strided_slice %17 {offsets = [0, 0, 0], sizes = [8, 16, 128], strides = [1, 1, 1]} : vector<10x24x128xbf16> to vector<8x16x128xbf16>
    %19 = vector.shape_cast %18 : vector<8x16x128xbf16> to vector<128x128xbf16>
    %20 = vector.extract_strided_slice %17 {offsets = [0, 1, 0], sizes = [8, 16, 128], strides = [1, 1, 1]} : vector<10x24x128xbf16> to vector<8x16x128xbf16>
    %21 = vector.shape_cast %20 : vector<8x16x128xbf16> to vector<128x128xbf16>
    %22 = vector.extract_strided_slice %17 {offsets = [0, 2, 0], sizes = [8, 16, 128], strides = [1, 1, 1]} : vector<10x24x128xbf16> to vector<8x16x128xbf16>
    %23 = vector.shape_cast %22 : vector<8x16x128xbf16> to vector<128x128xbf16>
    %24 = vector.extract_strided_slice %17 {offsets = [1, 0, 0], sizes = [8, 16, 128], strides = [1, 1, 1]} : vector<10x24x128xbf16> to vector<8x16x128xbf16>
    %25 = vector.shape_cast %24 : vector<8x16x128xbf16> to vector<128x128xbf16>
    %26 = vector.extract_strided_slice %17 {offsets = [1, 1, 0], sizes = [8, 16, 128], strides = [1, 1, 1]} : vector<10x24x128xbf16> to vector<8x16x128xbf16>
    %27 = vector.shape_cast %26 : vector<8x16x128xbf16> to vector<128x128xbf16>
    %28 = vector.extract_strided_slice %17 {offsets = [1, 2, 0], sizes = [8, 16, 128], strides = [1, 1, 1]} : vector<10x24x128xbf16> to vector<8x16x128xbf16>
    %29 = vector.shape_cast %28 : vector<8x16x128xbf16> to vector<128x128xbf16>
    %30 = vector.extract_strided_slice %17 {offsets = [2, 0, 0], sizes = [8, 16, 128], strides = [1, 1, 1]} : vector<10x24x128xbf16> to vector<8x16x128xbf16>
    %31 = vector.shape_cast %30 : vector<8x16x128xbf16> to vector<128x128xbf16>
    %32 = vector.extract_strided_slice %17 {offsets = [2, 1, 0], sizes = [8, 16, 128], strides = [1, 1, 1]} : vector<10x24x128xbf16> to vector<8x16x128xbf16>
    %33 = vector.shape_cast %32 : vector<8x16x128xbf16> to vector<128x128xbf16>
    %34 = vector.extract_strided_slice %17 {offsets = [2, 2, 0], sizes = [8, 16, 128], strides = [1, 1, 1]} : vector<10x24x128xbf16> to vector<8x16x128xbf16>
    %35 = vector.shape_cast %34 : vector<8x16x128xbf16> to vector<128x128xbf16>
    %36 = tpu.concatenate %19, %21, %23, %25, %27, %29, %31, %33, %35 in 1 : vector<128x128xbf16>, vector<128x128xbf16>, vector<128x128xbf16>, vector<128x128xbf16>, vector<128x128xbf16>, vector<128x128xbf16>, vector<128x128xbf16>, vector<128x128xbf16>, vector<128x128xbf16> -> vector<128x1152xbf16>
    %c0_10 = arith.constant 0 : index
    %c0_11 = arith.constant 0 : index
    %37 = vector.load %arg3[%c0_10, %c0_11] : memref<1152x128xbf16, #tpu.memory_space<vmem>>, vector<1152x128xbf16>
    %cst = arith.constant dense<0.000000e+00> : vector<128x128xf32>
    %38 = tpu.matmul %36, %37, %cst {dimension_numbers = #tpu.dot_dimension_numbers<[1], [0], [0], [1], [0, 0, 1, 1], [], []>} : vector<128x1152xbf16>, vector<1152x128xbf16>, vector<128x128xf32> -> vector<128x128xf32>
    %c0_12 = arith.constant 0 : index
    %c0_13 = arith.constant 0 : index
    %39 = vector.load %arg4[%c0_12, %c0_13] : memref<1x128xf32, #tpu.memory_space<vmem>>, vector<1x128xf32>
    %40 = vector.shape_cast %39 : vector<1x128xf32> to vector<128xf32>
    %41 = vector.shape_cast %40 : vector<128xf32> to vector<1x128xf32>
    %42 = vector.broadcast %41 : vector<1x128xf32> to vector<128x128xf32>
    %43 = arith.addf %38, %42 : vector<128x128xf32>
    %cst_14 = arith.constant 0.000000e+00 : f32
    %44 = vector.broadcast %cst_14 : f32 to vector<128x128xf32>
    %45 = arith.maximumf %43, %44 : vector<128x128xf32>
    %46 = vector.shape_cast %45 : vector<128x128xf32> to vector<1x8x16x128xf32>
    %c0_15 = arith.constant 0 : index
    %c0_16 = arith.constant 0 : index
    %c0_17 = arith.constant 0 : index
    %c0_18 = arith.constant 0 : index
    %47 = vector.load %arg5[%c0_15, %c0_16, %c0_17, %c0_18] : memref<1x8x16x128xf32, #tpu.memory_space<vmem>>, vector<1x8x16x128xf32>
    tpu.vector_store %arg5[%c0_15, %c0_16, %c0_17, %c0_18], %46 {strides = array<i32>} : memref<1x8x16x128xf32, #tpu.memory_space<vmem>>, vector<1x8x16x128xf32>,
    return
  }
  func.func @transform_1(%arg0: i32, %arg1: i32) -> (i32, i32) {
    %c0_i32 = arith.constant 0 : i32
    %c0_i32_0 = arith.constant 0 : i32
    %c0_i32_1 = arith.constant 0 : i32
    return %c0_i32, %c0_i32_0 : i32, i32
  }
  func.func @transform_2(%arg0: i32, %arg1: i32) -> (i32, i32) {
    %c0_i32 = arith.constant 0 : i32
    %c0_i32_0 = arith.constant 0 : i32
    %c0_i32_1 = arith.constant 0 : i32
    return %c0_i32, %c0_i32_0 : i32, i32
  }
  func.func @transform_3(%arg0: i32, %arg1: i32) -> (i32, i32, i32, i32) {
    %c0_i32 = arith.constant 0 : i32
    %c0_i32_0 = arith.constant 0 : i32
    %c0_i32_1 = arith.constant 0 : i32
    return %arg0, %arg1, %c0_i32, %c0_i32_0 : i32, i32, i32, i32
  }
}

</mosaic_0001>

<bundles_post_ra>
// kernel: tpu_custom_call.1
= control target key start
LH: loop header
LB: loop body
LE: loop exit
PB: predicated region body
PF: predicated region fallthrough
CT: control target
= control target key end

     0   :  { %s3485_s0 = inlined_call_operand.hbm [shape: bf16[2,18,24,128], index: 0, kind: input, shape index: {}]   ;;  %s3486_s1 = inlined_call_operand.hbm [shape: bf16[1152,128], index: 1, kind: input, shape index: {}]   ;;  %s3487_s2 = inlined_call_operand.vmem [shape: f32[1,128], index: 2, kind: input, shape index: {}]   ;;  %s3488_s3 = inlined_call_operand.hbm [shape: f32[2,16,16,128], index: 3, kind: output, shape index: {}]  }
   0x1   :  { %3499 = sst [smem:[#allocation20_spill]] %s3486_s1 }
   0x2   :  { %8 = vsyncpa [#allocation5], 0 }
   0x3   :  { %9 = vsyncpa [#allocation6], 0 }
   0x4   :  { %11 = vsyncpa [#allocation6 + $0x1], 0  ;;  %s2773_s12 = smov 0   ;;  %s2775_s13 = smov 0  }
   0x5   :  { %s2777_s14 = smov 0   ;;  %s2779_s15 = smov 0  }
   0x6   :  { %s2781_s16 = smov 0   ;;  %s2783_s17 = smov 0  }
   0x7   :  { %s2785_s18 = smov 0   ;;  %s2787_s19 = smov 0  }
   0x8 LB: > { %3500 = sst [smem:[#allocation17_spill]] %s2740_s18  ;;  %s1925_s20 = sadd.s32 4294967295, %s2744_s19   ;;  %s2744_s19 = sphi %s2787_s19, %s17_s19   ;;  %s2740_s18 = sphi %s2785_s18, %s3523_s18   ;;  %s2736_s17 = sphi %s2783_s17, %s3528_s17   ;;  %s2732_s16 = sphi %s2781_s16, %s3521_s16   ;;  %s2728_s15 = sphi %s2779_s15, %s3527_s15   ;;  %s2724_s14 = sphi %s2777_s14, %s3526_s14   ;;  %s2720_s13 = sphi %s2775_s13, %s3525_s13   ;;  %s2716_s12 = sphi %s2773_s12, %s3524_s12  }
   0x9   : > { %s1926_s21 = sadd.s32 4294967294, %s2744_s19   ;;  %s26_s22 = sadd.s32 1, %s2736_s17 }
   0xa   : > { %s29_s23 = sadd.s32 1, %s2740_s18  ;;  %p27_p0 = scmp.ge.s32.totalorder %s26_s22, 2 }
   0xb   : > { %s80_s24 = sadd.s32 1, %s2724_s14  ;;  %p90_p1 = scmp.ne.s32.totalorder %s2724_s14, %s2720_s13 }
   0xc   : > { %p91_p2 = scmp.eq.s32.totalorder %s1925_s20, 3  ;;  %s3530_s22 = smov (%p27_p0, %s26_s22), 0 }
   0xd   : > { %3501 = sst [smem:[#allocation18_spill]] %s3530_s22  ;;  %s3532_s23 = smov (!%p27_p0, %s29_s23), %s2740_s18 }
   0xe   : > { %s76_s25 = ssub.s32 %s2736_s17, %s3530_s22  ;;  %p2825_p3 = por %p91_p2, %p90_p1 }
   0xf   : > { %p31_p4 = scmp.ge.s32.totalorder %s3532_s23, 2  ;;  %p96_p5 = scmp.ne.s32.totalorder %s2720_s13, %s2716_s12 }
  0x10   : > { %s3502_s26 = scalar_select %p2825_p3, 1, 0 }
  0x11   : > { %p97_p6 = scmp.eq.s32.totalorder %s1926_s21, 3  ;;  %p1927_p7 = scmp.ge.s32.totalorder %s2744_s19, 1 }
  0x12   : > { %s3534_s23 = smov (%p31_p4, %s3532_s23), 0  ;;  %p104_p9 = scmp.lt.s32.totalorder %s2744_s19, 5 }
  0x13   : > { %3503 = sst [smem:[#allocation19_spill]] %s3534_s23  ;;  %p2834_p8 = por %p97_p6, %p96_p5 }
  0x14   : > { %s75_s28 = ssub.s32 %s2740_s18, %s3534_s23  ;;  %p2841_p10 = pnand %p1927_p7, %p104_p9 }
  0x15   : > { %s3504_s27 = scalar_select %p2834_p8, 1, 0 }
  0x16   : > { %s77_s29 = sor.u32 %s76_s25, %s75_s28  ;;  %p2845_p12 = scmp.eq.s32.totalorder %s1925_s20, 0 }
  0x17   : > { %s3505_s30 = scalar_select %p2841_p10, 1, 0 }
  0x18   : > { %p78_p11 = scmp.eq.s32.totalorder %s77_s29, 0  ;;  %p2394_p13 = pneg %p2841_p10 }
  0x19   : > { %s3506_s4 = scalar_select %p2845_p12, 1, 0 }
  0x1a   : > { %s2852_s5 = scalar_select %p78_p11, %s2724_s14, %s80_s24  }
  0x1b   : > { %s2746_s6 = smov [#allocation4]   ;;  %p2856_p0 = pnand %p2845_p12, %p2394_p13 }
  0x1c   : > { %s116_s7 = sshll.u32 %s2746_s6, 4  ;;  %s3508_s1 = sld [smem:[#allocation20_spill]]  ;;  %s117_s7 = int_to_ptr.vmem [resolvable:$true] %s116_s7 }
  0x1d   : > { %p2561_p2 = pneg %p2856_p0 }
  0x22   : > { %s2559_s11 = scalar_lea.hbm %s3508_s1, 9216 }
  0x23   : > { %p2560_p1 = scmp.ne.s32.totalorder %s3508_s1, %s2559_s11  ;;  %p2566_p6 = scmp.lt.u32.totalorder %s2559_s11, %s3508_s1 }
  0x25   : > { %p2562_p4 = pnand %p2561_p2, %p2560_p1 }
  0x27   : > { %p2563_p5 = pneg %p2562_p4 }
  0x29   : > { %p2568_p7 = pnand %p2566_p6, %p2563_p5 }
  0x2b   : > { %2571 = shalt.err (!%p2568_p7)
}
  0x2c   : > { %s2572_s28 = scalar_lea.vmem %s117_s7, 9216  ;;  %p2580_p8 = scmp.lt.s32.totalorder %s117_s7, %s117_s7 }
  0x2d   : > { %p2573_p9 = scmp.ne.s32.totalorder %s117_s7, %s2572_s28  ;;  %p2581_p3 = scmp.lt.s32.totalorder %s2572_s28, %s2572_s28 }
  0x2f   : > { %p2575_p11 = pnand %p2573_p9, %p2561_p2  ;;  %p2582_p12 = por %p2581_p3, %p2580_p8 }
  0x31   : > { %p2576_p13 = pneg %p2575_p11 }
  0x33   : > { %p2583_p10 = pnand %p2582_p12, %p2576_p13 }
  0x35   : > { %2586 = shalt.err (!%p2583_p10)
}
  0x36   : > { %s2747_s29 = smov 64   ;;  %s2748_s6 = smov 4  }
  0x37   : > { %2397 = dma.hbm_to_vmem [thread:$0]  (!%p2856_p0), %s3508_s1, 9216, %s117_s7, [#allocation5], %s2747_s29, %s2747_s29, %s2748_s6  }
  0x38   : > { %p3509_p1 = scmp.ne.s32.totalorder %s3505_s30, 0 }
  0x39   : > { %p3510_p4 = scmp.ne.s32.totalorder (!%p3509_p1), %s3506_s4, 0 }
  0x3a   : > { %135 = sbr.rel (%p3509_p1) target bundleno = 526 (0x20e), region = 28 }
  0x41   : > { %2705 = dma.done.wait (%p3510_p4), [#allocation5], 9216  }
  0x42   : > { %2707 = vsyncadd (%p3510_p4), [#allocation5], 4294958080  ;;  %s3493_s8 = sand.u32 1, %s2720_s13   ;;  %s2884_s11 = sand.u32 1, %s2728_s15 }
  0x43   : > { %s2888_s7 = sshll.u32 %s3493_s8, 7  ;;  %p2404_p3 = scmp.eq.s32.totalorder %s2728_s15, 0 }
  0x44   : > { %s2060_s30 = smul.u32 3456, %s2732_s16  ;;  %s2749_s20 = smov [#allocation2]  }
  0x45   : > { %s169_s21 = sshll.u32 %s2749_s20, 4  ;;  %s2061_s24 = smul.u32 120, %s2884_s11  ;;  %s2896_s21 = int_to_ptr.vmem [resolvable:$true] %s169_s21 }
  0x46   : > { %s161_s28 = scalar_lea.hbm %s3485_s0, %s2060_s30  ;;  %s3496_s10 = scalar_lea.hbm %s3485_s0, 6912 }
  0x47   : > { %s2587_s29 = scalar_lea.hbm %s161_s28, 1920  ;;  %p2592_p0 = scmp.lt.u32.totalorder %s161_s28, %s3485_s0 }
  0x48   : > { %p2588_p8 = scmp.ne.s32.totalorder %s161_s28, %s2587_s29  ;;  %p2593_p2 = scmp.lt.u32.totalorder %s3496_s10, %s2587_s29 }
  0x49   : > { %p2595_p6 = scmp.lt.u32.totalorder %s2587_s29, %s161_s28 }
  0x4a   : > { %p2589_p10 = pnand %p2588_p8, %p2404_p3  ;;  %p2594_p5 = por %p2593_p2, %p2592_p0 }
  0x4c   : > { %p2590_p12 = pneg %p2589_p10  ;;  %p2596_p7 = por %p2595_p6, %p2594_p5 }
  0x4e   : > { %p2597_p9 = pnand %p2596_p7, %p2590_p12 }
  0x50   : > { %2600 = shalt.err (!%p2597_p9)  }
  0x51   : > { %s2601_s30 = scalar_lea.vmem %s2896_s21, 1920  ;;  %s3495_s1 = scalar_lea.vmem %s2896_s21, 3840 }
  0x52   : > { %p2602_p11 = scmp.ne.s32.totalorder %s2896_s21, %s2601_s30  ;;  %p2608_p4 = scmp.lt.s32.totalorder %s2896_s21, %s2896_s21 }
  0x53   : > { %p2609_p8 = scmp.lt.s32.totalorder %s3495_s1, %s2601_s30 }
  0x54   : > { %p2603_p13 = pnand %p2602_p11, %p2404_p3 }
  0x55   : > { %p2610_p10 = por %p2609_p8, %p2608_p4 }
  0x56   : > { %p2604_p1 = pneg %p2603_p13 }
  0x58   : > { %p2611_p0 = pnand %p2610_p10, %p2604_p1 }
  0x5a   : > { %2614 = shalt.err (!%p2611_p0)  }
  0x5b   : > { %2389 = dma.hbm_to_vmem [thread:$0]  (%p2404_p3), %s161_s28, 1920, %s2896_s21, [#allocation3] }
  0x5c   : > { %s2923_s23 = scalar_lea.vmem [#allocation7], %s2888_s7  ;;  %s2925_s8 = scalar_lea.vmem [#allocation2], %s2061_s24 }
  0x5d   : > { %s176_s4 = scalar_lea.sflag [#allocation3], %s2884_s11 }
  0x5e   : > { %2708 = dma.done.wait %s176_s4, 1920 }
  0x5f   : > { %2709 = vsyncadd %s176_s4, 4294965376  ;;  %s182_s25 = sadd.s32 1, %s2728_s15  ;;  %s187_s29 = ssub.s32 1, %s2884_s11  ;;  %v2477_v0 = vld [vmem:[#allocation4 + $0x40] sm:$0xff]  }
  0x60   : > { %s1870_s6 = smul.u32 24, %s2728_s15  ;;  %p2932_p12 = scmp.lt.s32.totalorder %s182_s25, 2  ;;  %v2478_v1 = vld [vmem:[#allocation4 + $0xc0] sm:$0xff]   ;;  %2064 = vmatprep.subr.bf16.mxu0 %v2477_v0 }
  0x61   : > { %s1871_s9 = smul.u32 54, %s2732_s16  ;;  %v2479_v2 = vld [vmem:[#allocation4] sm:$0xff]   ;;  %s197_s11 = scalar_lea.sflag [#allocation3], %s187_s29 }
  0x62   : > { %s2062_s7 = smul.u32 120, %s187_s29 }
  0x63   : > { %s1872_s28 = sadd.s32 %s1871_s9, %s1870_s6 }
  0x64   : > { %s1936_s24 = sshll.u32 %s1872_s28, 6  ;;  %s196_s10 = scalar_lea.vmem [#allocation2], %s2062_s7 }
  0x65   : > { %s1874_s4 = scalar_lea.hbm %s3485_s0, %s1936_s24  ;;  %s205_s22 = sshll.u32 %s196_s10, 4  ;;  %s206_s22 = int_to_ptr.vmem [resolvable:$true] %s205_s22 }
  0x66   : > { %s1875_s18 = scalar_lea.hbm %s1874_s4, 1536  ;;  %s2643_s25 = scalar_lea.hbm %s1874_s4, 3456 }
  0x67   : > { %p2616_p3 = scmp.ne.s32.totalorder %s1875_s18, %s2643_s25  ;;  %p2620_p6 = scmp.lt.u32.totalorder %s1875_s18, %s3485_s0 }
  0x68   : > { %s3512_s7 = scalar_lea.hbm %s3485_s0, 6912  ;;  %p2623_p11 = scmp.lt.u32.totalorder %s2643_s25, %s1875_s18 }
  0x69   : > { %p2617_p2 = pnand %p2616_p3, %p2932_p12  ;;  %p2621_p7 = scmp.lt.u32.totalorder %s3512_s7, %s2643_s25 }
  0x6b   : > { %p2618_p5 = pneg %p2617_p2  ;;  %p2622_p9 = por %p2621_p7, %p2620_p6 }
  0x6d   : > { %p2624_p13 = por %p2623_p11, %p2622_p9 }
  0x6f   : > { %p2625_p1 = pnand %p2624_p13, %p2618_p5 }
  0x71   : > { %2628 = shalt.err (!%p2625_p1)  }
  0x72   : > { %s2629_s10 = scalar_lea.vmem %s206_s22, 1920  ;;  %p2636_p0 = scmp.lt.s32.totalorder %s206_s22, %s2896_s21 }
  0x73   : > { %p2630_p4 = scmp.ne.s32.totalorder %s206_s22, %s2629_s10  ;;  %s3513_s29 = scalar_lea.vmem %s2896_s21, 3840 }
  0x74   : > { %p2637_p3 = scmp.lt.s32.totalorder %s3513_s29, %s2629_s10 }
  0x75   : > { %p2631_p8 = pnand %p2630_p4, %p2932_p12 }
  0x76   : > { %p2638_p2 = por %p2637_p3, %p2636_p0 }
  0x77   : > { %p2632_p10 = pneg %p2631_p8 }
  0x79   : > { %p2639_p6 = pnand %p2638_p2, %p2632_p10 }
  0x7b   : > { %2642 = shalt.err (!%p2639_p6)  }
  0x7c   : > { %2391 = dma.hbm_to_vmem [thread:$0]  (%p2932_p12), %s1875_s18, 1920, %s206_s22, %s197_s11  ;;  %2128 = vmatprep.subr.bf16.mxu1 %v2478_v1  ;;  %v2480_v3 = vld [vmem:[#allocation4 + $0x80] sm:$0xff]   ;;  %2065 = vmatpush3.bf16.msra.mxu0 %v2479_v2  ;;  %v2481_v4 = vld [vmem:[#allocation4 + $0x48] sm:$0xff]   ;;  %v2485_v8 = vld [vmem:[#allocation4 + $0x50] sm:$0xff]   ;;  %vm239_vm0 = vsmask.f32 3328 }
  0x7d   : > { %2129 = vmatpush3.bf16.msra.mxu1 %v2480_v3  ;;  %v2482_v5 = vld [vmem:[#allocation4 + $0xc8] sm:$0xff]   ;;  %2066 = vmatprep.subr.bf16.mxu0 %v2481_v4  ;;  %v2486_v9 = vld [vmem:[#allocation4 + $0xd0] sm:$0xff]   ;;  %v2489_v12 = vld [vmem:[#allocation4 + $0x58] sm:$0xff]   ;;  %vm240_vm1 = vsmask.f32 7440  ;;  %vm458_vm2 = vcmask 1042432  }
  0x7e   : > { %v2483_v6 = vld [vmem:[#allocation4 + $0x8] sm:$0xff]   ;;  %2130 = vmatprep.subr.bf16.mxu1 %v2482_v5  ;;  %v2487_v10 = vld [vmem:[#allocation4 + $0x10] sm:$0xff]   ;;  %v2490_v13 = vld [vmem:[#allocation4 + $0xd8] sm:$0xff]   ;;  %vm459_vm3 = vcmask 1046532   ;;  %s2063_s21 = sshll.u32 %s2728_s15, 4  ;;  %s3518_s11 = sand.u32 1, %s2720_s13  }
  0x7f   : > { %v2484_v7 = vld [vmem:[#allocation4 + $0x88] sm:$0xff]   ;;  %v2488_v11 = vld [vmem:[#allocation4 + $0x90] sm:$0xff]   ;;  %v2491_v14 = vld [vmem:[#allocation4 + $0x18] sm:$0xff]   ;;  %s3433_s25 = scalar_lea.sflag [#allocation6], %s3518_s11  ;;  %p3519_p5 = scmp.ne.s32.totalorder %s3502_s26, 0 }
  0x80   : > { %2067 = vmatpush3.bf16.msra.mxu0 %v2483_v6  ;;  %v2492_v15 = vld [vmem:[#allocation4 + $0x98] sm:$0xff]   ;;  %v2493_v16 = vld [vmem:[#allocation4 + $0x60] sm:$0xff]   ;;  %v2497_v20 = vld [vmem:[#allocation4 + $0x68] sm:$0xff]   ;;  %s2750_s9 = smov [#allocation7]  }
  0x81   : > { %2131 = vmatpush3.bf16.msra.mxu1 %v2484_v7  ;;  %2068 = vmatprep.subr.bf16.mxu0 %v2485_v8  ;;  %v2494_v17 = vld [vmem:[#allocation4 + $0xe0] sm:$0xff]   ;;  %v2498_v21 = vld [vmem:[#allocation4 + $0xe8] sm:$0xff]   ;;  %v2501_v24 = vld [vmem:[#allocation4 + $0x70] sm:$0xff]   ;;  %s2648_s28 = sshll.u32 %s2750_s9, 4  ;;  %s2649_s28 = int_to_ptr.vmem [resolvable:$false] %s2648_s28 }
  0x82   : > { %2132 = vmatprep.subr.bf16.mxu1 %v2486_v9  ;;  %v2495_v18 = vld [vmem:[#allocation4 + $0x20] sm:$0xff]   ;;  %v2499_v22 = vld [vmem:[#allocation4 + $0x28] sm:$0xff]   ;;  %v2502_v25 = vld [vmem:[#allocation4 + $0xf0] sm:$0xff]   ;;  %s2650_s1 = scalar_lea.vmem %s2649_s28, 4096 }
  0x83   : > { %v2496_v19 = vld [vmem:[#allocation4 + $0xa0] sm:$0xff]   ;;  %v2500_v23 = vld [vmem:[#allocation4 + $0xa8] sm:$0xff]   ;;  %v2503_v26 = vld [vmem:[#allocation4 + $0x30] sm:$0xff]  }
  0x84   : > { %2069 = vmatpush3.bf16.msra.mxu0 %v2487_v10  ;;  %v2504_v27 = vld [vmem:[#allocation4 + $0xb0] sm:$0xff]   ;;  %v2505_v28 = vld [vmem:[#allocation4 + $0x78] sm:$0xff]   ;;  %vm2977_vm4 = vmor %vm458_vm2, %vm459_vm3 }
  0x85   : > { %2133 = vmatpush3.bf16.msra.mxu1 %v2488_v11  ;;  %2070 = vmatprep.subr.bf16.mxu0 %v2489_v12  ;;  %v2506_v29 = vld [vmem:[#allocation4 + $0xf8] sm:$0xff]   ;;  %v2956_v32 = vld [vmem:[%s2925_s8] sm:$0xf]  ;;  %v2959_v33 = vld [vmem:[%s2925_s8 + $0x4] sm:$0xf] }
  0x86   : > { %2134 = vmatprep.subr.bf16.mxu1 %v2490_v13  ;;  %v2507_v30 = vld [vmem:[#allocation4 + $0x38] sm:$0xff]   ;;  %v243_v35 = vshrl.u32 %v2956_v32, 16  ;;  %v246_v36 = vshll.u32 %v2956_v32, 16  ;;  %v252_v37 = vshll.u32 %v2959_v33, 16  ;;  %v256_v38 = vshrl.u32 %v2959_v33, 16  ;;  %v2511_v57 = vld [vmem:[#allocation4 + $0x140] sm:$0xff]   ;;  %vm2988_vm5 = vmor %vm239_vm0, %vm240_vm1 }
  0x87   : > { %v2508_v31 = vld [vmem:[#allocation4 + $0xb8] sm:$0xff]   ;;  %v1938_v60 = vrot.slane %v2956_v32, 9  ;;  %v463_v61 = vrot.slane %v2959_v33, 5  ;;  %v2512_v62 = vld [vmem:[#allocation4 + $0x1c0] sm:$0xff]   ;;  %v1948_v3 = vcombine.low %v2956_v32, %v2959_v33 }
  0x88   : > { %2071 = vmatpush3.bf16.msra.mxu0 %v2491_v14  ;;  %v211_v34 = vld [vmem:[%s2925_s8 + $0x8] sm:$0xf]  ;;  %v2967_v39 = vld [vmem:[%s2925_s8 + $0xc] sm:$0xf]  ;;  %v2970_v41 = vld [vmem:[%s2925_s8 + $0x10] sm:$0xf] }
  0x89   : > { %2135 = vmatpush3.bf16.msra.mxu1 %v2492_v15  ;;  %2072 = vmatprep.subr.bf16.mxu0 %v2493_v16  ;;  %v262_v40 = vshll.u32 %v211_v34, 16  ;;  %v267_v42 = vshrl.u32 %v2967_v39, 16  ;;  %v270_v43 = vshll.u32 %v2967_v39, 16  ;;  %v245_v44 = vrot.slane %v243_v35, 4  ;;  %v2513_v6 = vld [vmem:[#allocation4 + $0x100] sm:$0xff]  }
  0x8a   : > { %2136 = vmatprep.subr.bf16.mxu1 %v2494_v17  ;;  %v248_v45 = vrot.slane %v246_v36, 5  ;;  %v254_v46 = vrot.slane %v252_v37, 5  ;;  %v258_v47 = vrot.slane %v256_v38, 4  ;;  %v276_v51 = vshll.u32 %v2970_v41, 16  ;;  %v2514_v7 = vld [vmem:[#allocation4 + $0x180] sm:$0xff]   ;;  %v2519_v36 = vld [vmem:[#allocation4 + $0x188] sm:$0xff]  }
  0x8b   : > { %v264_v48 = vrot.slane %v262_v40, 5  ;;  %v269_v49 = vrot.slane %v267_v42, 4  ;;  %v272_v50 = vrot.slane %v270_v43, 5  ;;  %v280_v55 = vshrl.u32 %v2970_v41, 16  ;;  %v214_v11 = vld [vmem:[%s2925_s8 + $0x14] sm:$0xf] }
  0x8c   : > { %2073 = vmatpush3.bf16.msra.mxu0 %v2495_v18  ;;  %v249_v53 = vor.u32 %v248_v45, %v245_v44  ;;  %v259_v54 = vor.u32 %v258_v47, %v254_v46  ;;  %v2984_v56 = vcombine.low %v2967_v39, %v2970_v41  ;;  %v466_v59 = vrot.slane %v211_v34, 5  ;;  %v3005_v13 = vld [vmem:[%s2925_s8 + $0x18] sm:$0xf]  ;;  %v3011_v18 = vld [vmem:[%s2925_s8 + $0x1c] sm:$0xf] }
  0x8d   : > { %2137 = vmatpush3.bf16.msra.mxu1 %v2496_v19  ;;  %2074 = vmatprep.subr.bf16.mxu0 %v2497_v20  ;;  %v273_v63 = vor.u32 %v272_v50, %v269_v49  ;;  %v282_v2 = vrot.slane %v280_v55, 4  ;;  %v464_v4 = vsel %vm2977_vm4, %v1938_v60, %v463_v61  ;;  %v465_v5 = vrot.slane %v463_v61, 4  ;;  %v2518_v34 = vld [vmem:[#allocation4 + $0x108] sm:$0xff]  }
  0x8e   : > { %2138 = vmatprep.subr.bf16.mxu1 %v2498_v21  ;;  %v250_v0 = vrot.slane %v249_v53, 4  ;;  %v260_v1 = vrot.slane %v259_v54, 4  ;;  %1417 = vmatprep.mubr.bf16.mxu1 %v2984_v56  ;;  %v278_v12 = vrot.slane %v276_v51, 5  ;;  %v1939_v14 = vrot.slane %v2967_v39, 9  ;;  %v217_v37 = vld [vmem:[%s2925_s8 + $0x20] sm:$0xf] }
  0x8f   : > { %v274_v8 = vrot.slane %v273_v63, 4  ;;  %v467_v16 = vsel %vm2977_vm4, %v465_v5, %v466_v59  ;;  %v286_v17 = vshll.u32 %v214_v11, 16  ;;  %v291_v19 = vshrl.u32 %v3005_v13, 16  ;;  %v3035_v45 = vld [vmem:[%s2925_s8 + $0x24] sm:$0xf] }
  0x90   : > { %2075 = vmatpush3.bf16.msra.mxu0 %v2499_v22  ;;  %v255_v9 = vsel %vm2988_vm5, %v250_v0, %v254_v46  ;;  %v265_v10 = vsel %vm2988_vm5, %v260_v1, %v264_v48  ;;  %v1964_v20 = vcombine.low %v464_v4, %v467_v16  ;;  %v283_v21 = vor.u32 %v282_v2, %v278_v12  ;;  %v3038_v46 = vld [vmem:[%s2925_s8 + $0x28] sm:$0xf] }
  0x91   : > { %2139 = vmatpush3.bf16.msra.mxu1 %v2500_v23  ;;  %2076 = vmatprep.subr.bf16.mxu0 %v2501_v24  ;;  %v1956_v15 = vcombine.low %v255_v9, %v265_v10  ;;  %v294_v22 = vshll.u32 %v3005_v13, 16  ;;  %v2516_v23 = vld [vmem:[#allocation4 + $0x148] sm:$0xff]   ;;  %v288_v24 = vrot.slane %v286_v17, 5  ;;  %v293_v38 = vrot.slane %v291_v19, 4  ;;  %v2522_v63 = vld [vmem:[#allocation4 + $0x1d0] sm:$0xff]  }
  0x92   : > { %2140 = vmatprep.subr.bf16.mxu1 %v2502_v25  ;;  %v304_v25 = vshrl.u32 %v3011_v18, 16  ;;  %v300_v40 = vshll.u32 %v3011_v18, 16  ;;  %v310_v44 = vshll.u32 %v217_v37, 16  ;;  %v315_v50 = vshrl.u32 %v3035_v45, 16  ;;  %v2523_v1 = vld [vmem:[#allocation4 + $0x110] sm:$0xff]  }
  0x93   : > { %1320 = vmatprep.mubr.bf16.mxu0 %v1956_v15  ;;  %v296_v39 = vrot.slane %v294_v22, 5  ;;  %v318_v53 = vshll.u32 %v3035_v45, 16  ;;  %v328_v54 = vshrl.u32 %v3038_v46, 16  ;;  %v3048_v55 = vcombine.low %v3035_v45, %v3038_v46  ;;  %v3069_v15 = vld [vmem:[%s2925_s8 + $0x34] sm:$0xf] }
  0x94   : > { %2077 = vmatpush3.bf16.msra.mxu0 %v2503_v26  ;;  %v3018_v26 = vcombine.low %v3005_v13, %v3011_v18  ;;  %v306_v43 = vrot.slane %v304_v25, 4  ;;  %v302_v49 = vrot.slane %v300_v40, 5  ;;  %v312_v51 = vrot.slane %v310_v44, 5 }
  0x95   : > { %2141 = vmatpush3.bf16.msra.mxu1 %v2504_v27  ;;  %2078 = vmatprep.subr.bf16.mxu0 %v2505_v28  ;;  %v470_v27 = vrot.slane %v2970_v41, 5  ;;  %v2517_v28 = vld [vmem:[#allocation4 + $0x1c8] sm:$0xff]   ;;  %v297_v48 = vor.u32 %v296_v39, %v293_v38  ;;  %v1940_v61 = vrot.slane %v3005_v13, 9  ;;  %v480_v0 = vrot.slane %v217_v37, 5 }
  0x96   : > { %2142 = vmatprep.subr.bf16.mxu1 %v2506_v29  ;;  %v279_v29 = vsel %vm2988_vm5, %v274_v8, %v278_v12  ;;  %v307_v60 = vor.u32 %v306_v43, %v302_v49  ;;  %v317_v8 = vrot.slane %v315_v50, 4  ;;  %v320_v9 = vrot.slane %v318_v53, 5  ;;  %v223_v39 = vld [vmem:[%s2925_s8 + $0x38] sm:$0xf] }
  0x97   : > { %v471_v32 = vsel %vm2977_vm4, %v1939_v14, %v470_v27  ;;  %v472_v33 = vrot.slane %v470_v27, 4  ;;  %v298_v59 = vrot.slane %v297_v48, 4  ;;  %v330_v12 = vrot.slane %v328_v54, 4  ;;  %v3066_v14 = vld [vmem:[%s2925_s8 + $0x30] sm:$0xf] }
  0x98   : > { %2079 = vmatpush3.bf16.msra.mxu0 %v2507_v30  ;;  %v284_v30 = vrot.slane %v283_v21, 4  ;;  %v339_v22 = vshrl.u32 %v3066_v14, 16  ;;  %v2531_v43 = vld [vmem:[#allocation4 + $0x160] sm:$0xff]   ;;  %v358_v48 = vshll.u32 %v223_v39, 16 }
  0x99   : > { %2143 = vmatpush3.bf16.msra.mxu1 %v2508_v31  ;;  %2192 = vmatprep.subr.bf16.mxu0 %v2511_v57  ;;  %v473_v31 = vrot.slane %v214_v11, 5  ;;  %v2521_v57 = vld [vmem:[#allocation4 + $0x150] sm:$0xff]   ;;  %v303_v2 = vsel %vm2988_vm5, %v298_v59, %v302_v49  ;;  %v3097_v49 = vld [vmem:[%s2925_s8 + $0x3c] sm:$0xf] }
  0x9a   : > { %2256 = vmatprep.subr.bf16.mxu1 %v2512_v62  ;;  %v289_v35 = vsel %vm2988_vm5, %v284_v30, %v288_v24  ;;  %v477_v62 = vrot.slane %v3011_v18, 5  ;;  %v321_v18 = vor.u32 %v320_v9, %v317_v8  ;;  %v352_v24 = vshrl.u32 %v3069_v15, 16  ;;  %v2527_v30 = vld [vmem:[#allocation4 + $0x1d8] sm:$0xff]   ;;  %v2532_v50 = vld [vmem:[#allocation4 + $0x1e0] sm:$0xff]  }
  0x9b   : > { %1321 = vmatmul.mubr.bf16.vlgmr.msra.gmra.mrb[0].mxu0 %v1948_v3  ;;  %v3030_v41 = vcombine.low %v279_v29, %v289_v35  ;;  %v474_v42 = vsel %vm2977_vm4, %v472_v33, %v473_v31  ;;  %v308_v3 = vrot.slane %v307_v60, 4  ;;  %v1941_v29 = vrot.slane %v3035_v45, 9  ;;  %v2528_v31 = vld [vmem:[#allocation4 + $0x118] sm:$0xff]   ;;  %v2533_v60 = vld [vmem:[#allocation4 + $0x120] sm:$0xff]  }
  0x9c   : > { %1418 = vmatmul.mubr.bf16.vlgmr.msra.gmra.mrb[0].mxu1 %v1964_v20  ;;  %2193 = vmatpush3.bf16.msra.mxu0 %v2513_v6  ;;  %v3040_v47 = vcombine.low %v471_v32, %v474_v42  ;;  %v478_v4 = vsel %vm2977_vm4, %v1940_v61, %v477_v62  ;;  %v479_v5 = vrot.slane %v477_v62, 4  ;;  %v2524_v6 = vld [vmem:[#allocation4 + $0x190] sm:$0xff]   ;;  %v2526_v20 = vld [vmem:[#allocation4 + $0x158] sm:$0xff]   ;;  %v322_v25 = vrot.slane %v321_v18, 4  ;;  %v2537_v18 = vld [vmem:[#allocation4 + $0x1e8] sm:$0xff]  }
  0x9d   : > { %2257 = vmatpush3.bf16.msra.mxu1 %v2514_v7  ;;  %1425 = vmatprep.mubr.bf16.mxu1 %v3018_v26  ;;  %v220_v7 = vld [vmem:[%s2925_s8 + $0x2c] sm:$0xf]  ;;  %v313_v10 = vsel %vm2988_vm5, %v308_v3, %v312_v51  ;;  %v484_v32 = vrot.slane %v3038_v46, 5  ;;  %v341_v40 = vrot.slane %v339_v22, 4  ;;  %v348_v45 = vshll.u32 %v3069_v15, 16 }
  0x9e   : > { %2194 = vmatprep.subr.bf16.mxu0 %v2516_v23  ;;  %2258 = vmatprep.subr.bf16.mxu1 %v2517_v28  ;;  %v481_v11 = vsel %vm2977_vm4, %v479_v5, %v480_v0  ;;  %v334_v13 = vshll.u32 %v220_v7, 16  ;;  %v3071_v16 = vcombine.low %v303_v2, %v313_v10  ;;  %v342_v23 = vshll.u32 %v3066_v14, 16  ;;  %v2534_v0 = vld [vmem:[#allocation4 + $0x1a0] sm:$0xff]   ;;  %v2536_v5 = vld [vmem:[#allocation4 + $0x168] sm:$0xff]   ;;  %v3127_v22 = vld [vmem:[%s2925_s8 + $0x48] sm:$0xf] }
  0x9f   : > { %1328 = vmatprep.mubr.bf16.mxu0 %v3030_v41  ;;  %v3073_v17 = vcombine.low %v478_v4, %v481_v11  ;;  %v3081_v28 = vcombine.low %v3066_v14, %v3069_v15  ;;  %v487_v33 = vrot.slane %v220_v7, 5  ;;  %v485_v37 = vsel %vm2977_vm4, %v1941_v29, %v484_v32 }
  0xa0   : > { %2195 = vmatpush3.bf16.msra.mxu0 %v2518_v34  ;;  %v336_v21 = vrot.slane %v334_v13, 5  ;;  %v486_v38 = vrot.slane %v484_v32, 4  ;;  %v344_v42 = vrot.slane %v342_v23, 5  ;;  %v363_v59 = vshrl.u32 %v3097_v49, 16  ;;  %v226_v13 = vld [vmem:[%s2925_s8 + $0x44] sm:$0xf] }
  0xa1   : > { %2259 = vmatpush3.bf16.msra.mxu1 %v2519_v36  ;;  %2196 = vmatprep.subr.bf16.mxu0 %v2521_v57  ;;  %v2529_v36 = vld [vmem:[#allocation4 + $0x198] sm:$0xff]   ;;  %v3104_v57 = vld [vmem:[%s2925_s8 + $0x40] sm:$0xf]  ;;  %v350_v61 = vrot.slane %v348_v45, 5  ;;  %v360_v62 = vrot.slane %v358_v48, 5  ;;  %v1942_v4 = vrot.slane %v3066_v14, 9 }
  0xa2   : > { %2260 = vmatprep.subr.bf16.mxu1 %v2522_v63  ;;  %v488_v53 = vsel %vm2977_vm4, %v486_v38, %v487_v33  ;;  %v345_v54 = vor.u32 %v344_v42, %v341_v40  ;;  %v366_v63 = vshll.u32 %v3097_v49, 16  ;;  %v376_v3 = vshrl.u32 %v3104_v57, 16  ;;  %v2538_v33 = vld [vmem:[#allocation4 + $0x128] sm:$0xff]  }
  0xa3   : > { %1329 = vmatmul.mubr.bf16.gmra.mrb[4].mxu0 %v2984_v56  ;;  %v324_v56 = vshll.u32 %v3038_v46, 16  ;;  %v354_v46 = vrot.slane %v352_v24, 4  ;;  %v3115_v7 = vcombine.low %v3097_v49, %v3104_v57  ;;  %v491_v8 = vrot.slane %v3069_v15, 5  ;;  %v2539_v38 = vld [vmem:[#allocation4 + $0x1a8] sm:$0xff]  }
  0xa4   : > { %1426 = vmatmul.mubr.bf16.gmra.mrb[4].mxu1 %v3040_v47  ;;  %2197 = vmatpush3.bf16.msra.mxu0 %v2523_v1  ;;  %v3109_v1 = vcombine.low %v485_v37, %v488_v53  ;;  %v346_v2 = vrot.slane %v345_v54, 4  ;;  %v494_v9 = vrot.slane %v223_v39, 5  ;;  %v365_v14 = vrot.slane %v363_v59, 4  ;;  %v3155_v53 = vld [vmem:[%s2925_s8 + $0x54] sm:$0xf] }
  0xa5   : > { %1433 = vmatprep.mubr.bf16.mxu1 %v3048_v55  ;;  %2261 = vmatpush3.bf16.msra.mxu1 %v2524_v6  ;;  %v326_v19 = vrot.slane %v324_v56, 5  ;;  %v355_v6 = vor.u32 %v354_v46, %v350_v61  ;;  %v492_v11 = vsel %vm2977_vm4, %v1942_v4, %v491_v8  ;;  %v368_v15 = vrot.slane %v366_v63, 5 }
  0xa6   : > { %1336 = vmatprep.mubr.bf16.mxu0 %v3071_v16  ;;  %2198 = vmatprep.subr.bf16.mxu0 %v2526_v20  ;;  %v351_v56 = vsel %vm2988_vm5, %v346_v2, %v350_v61  ;;  %v378_v20 = vrot.slane %v376_v3, 4  ;;  %v390_v29 = vshll.u32 %v3127_v22, 16  ;;  %v1943_v37 = vrot.slane %v3097_v49, 9  ;;  %v3159_v61 = vld [vmem:[%s2925_s8 + $0x58] sm:$0xf] }
  0xa7   : > { %v331_v27 = vor.u32 %v330_v12, %v326_v19  ;;  %v327_v34 = vsel %vm2988_vm5, %v322_v25, %v326_v19  ;;  %2262 = vmatprep.subr.bf16.mxu1 %v2527_v30  ;;  %v356_v10 = vrot.slane %v355_v6, 4  ;;  %v493_v12 = vrot.slane %v491_v8, 4  ;;  %v3135_v25 = vld [vmem:[%s2925_s8 + $0x4c] sm:$0xf] }
  0xa8   : > { %2199 = vmatpush3.bf16.msra.mxu0 %v2528_v31  ;;  %v372_v19 = vshll.u32 %v3104_v57, 16  ;;  %v369_v31 = vor.u32 %v368_v15, %v365_v14  ;;  %v498_v42 = vrot.slane %v3104_v57, 5  ;;  %v3149_v45 = vcombine.low %v3127_v22, %v3135_v25  ;;  %v2542_v8 = vld [vmem:[#allocation4 + $0x1f0] sm:$0xff]  }
  0xa9   : > { %v332_v35 = vrot.slane %v331_v27, 4  ;;  %2263 = vmatpush3.bf16.msra.mxu1 %v2529_v36  ;;  %2200 = vmatprep.subr.bf16.mxu0 %v2531_v43  ;;  %v361_v23 = vsel %vm2988_vm5, %v356_v10, %v360_v62  ;;  %v495_v24 = vsel %vm2977_vm4, %v493_v12, %v494_v9  ;;  %v387_v27 = vshrl.u32 %v3127_v22, 16  ;;  %v2543_v10 = vld [vmem:[#allocation4 + $0x130] sm:$0xff]  }
  0xaa   : > { %2264 = vmatprep.subr.bf16.mxu1 %v2532_v50  ;;  %v3139_v30 = vcombine.low %v351_v56, %v361_v23  ;;  %v374_v32 = vrot.slane %v372_v19, 5  ;;  %v400_v36 = vshrl.u32 %v3135_v25, 16  ;;  %v370_v39 = vrot.slane %v369_v31, 4  ;;  %v229_v50 = vld [vmem:[%s2925_s8 + $0x50] sm:$0xf] }
  0xab   : > { %1337 = vmatmul.mubr.bf16.gmra.mrb[8].mxu0 %v3018_v26  ;;  %v337_v44 = vsel %vm2988_vm5, %v332_v35, %v336_v21  ;;  %v382_v21 = vshll.u32 %v226_v13, 16  ;;  %v501_v43 = vrot.slane %v226_v13, 5  ;;  %v500_v49 = vrot.slane %v498_v42, 4 }
  0xac   : > { %1434 = vmatmul.mubr.bf16.gmra.mrb[8].mxu1 %v3073_v17  ;;  %v3099_v51 = vcombine.low %v327_v34, %v337_v44  ;;  %2201 = vmatpush3.bf16.msra.mxu0 %v2533_v60  ;;  %v3141_v34 = vcombine.low %v492_v11, %v495_v24  ;;  %v379_v40 = vor.u32 %v378_v20, %v374_v32  ;;  %v2541_v44 = vld [vmem:[#allocation4 + $0x170] sm:$0xff]   ;;  %v389_v54 = vrot.slane %v387_v27, 4 }
  0xad   : > { %1441 = vmatprep.mubr.bf16.mxu1 %v3081_v28  ;;  %2265 = vmatpush3.bf16.msra.mxu1 %v2534_v0  ;;  %v384_v35 = vrot.slane %v382_v21, 5  ;;  %v375_v46 = vsel %vm2988_vm5, %v370_v39, %v374_v32  ;;  %v392_v57 = vrot.slane %v390_v29, 5  ;;  %v396_v59 = vshll.u32 %v3135_v25, 16  ;;  %v3195_v39 = vld [vmem:[%s2925_s8 + $0x60] sm:$0xf] }
  0xae   : > { %1344 = vmatprep.mubr.bf16.mxu0 %v3099_v51  ;;  %2202 = vmatprep.subr.bf16.mxu0 %v2536_v5  ;;  %v380_v48 = vrot.slane %v379_v40, 4  ;;  %v402_v60 = vrot.slane %v400_v36, 4  ;;  %v499_v63 = vsel %vm2977_vm4, %v1943_v37, %v498_v42  ;;  %v406_v0 = vshll.u32 %v229_v50, 16  ;;  %v2546_v40 = vld [vmem:[#allocation4 + $0x178] sm:$0xff]  }
  0xaf   : > { %2266 = vmatprep.subr.bf16.mxu1 %v2537_v18  ;;  %v411_v2 = vshrl.u32 %v3155_v53, 16  ;;  %v502_v4 = vsel %vm2977_vm4, %v500_v49, %v501_v43  ;;  %v393_v5 = vor.u32 %v392_v57, %v389_v54  ;;  %v398_v6 = vrot.slane %v396_v59, 5  ;;  %v2544_v18 = vld [vmem:[#allocation4 + $0x1b0] sm:$0xff]   ;;  %v2548_v57 = vld [vmem:[#allocation4 + $0x138] sm:$0xff]  }
  0xb0   : > { %2203 = vmatpush3.bf16.msra.mxu0 %v2538_v33  ;;  %v385_v62 = vsel %vm2988_vm5, %v380_v48, %v384_v35  ;;  %v414_v9 = vshll.u32 %v3155_v53, 16  ;;  %v424_v56 = vshrl.u32 %v3159_v61, 16  ;;  %v408_v13 = vrot.slane %v406_v0, 5 }
  0xb1   : > { %2267 = vmatpush3.bf16.msra.mxu1 %v2539_v38  ;;  %2204 = vmatprep.subr.bf16.mxu0 %v2541_v44  ;;  %v3168_v3 = vcombine.low %v375_v46, %v385_v62  ;;  %v394_v11 = vrot.slane %v393_v5, 4  ;;  %v403_v12 = vor.u32 %v402_v60, %v398_v6  ;;  %v505_v14 = vrot.slane %v3135_v25, 5  ;;  %v232_v25 = vld [vmem:[%s2925_s8 + $0x5c] sm:$0xf]  ;;  %v3203_v44 = vld [vmem:[%s2925_s8 + $0x64] sm:$0xf] }
  0xb2   : > { %2268 = vmatprep.subr.bf16.mxu1 %v2542_v8  ;;  %v3177_v15 = vcombine.low %v499_v63, %v502_v4  ;;  %v3181_v19 = vcombine.low %v3155_v53, %v3159_v61  ;;  %v1944_v20 = vrot.slane %v3127_v22, 9  ;;  %v413_v21 = vrot.slane %v411_v2, 4  ;;  %v2547_v46 = vld [vmem:[#allocation4 + $0x1f8] sm:$0xff]  }
  0xb3   : > { %1345 = vmatmul.mubr.bf16.gmra.mrb[12].mxu0 %v3048_v55  ;;  %v399_v23 = vsel %vm2988_vm5, %v394_v11, %v398_v6  ;;  %v404_v24 = vrot.slane %v403_v12, 4  ;;  %v507_v27 = vrot.slane %v505_v14, 4  ;;  %v508_v29 = vrot.slane %v229_v50, 5  ;;  %v2549_v60 = vld [vmem:[#allocation4 + $0x1b8] sm:$0xff]   ;;  %v2552_v11 = vld [vmem:[#allocation4 + $0x210] sm:$0xff]  }
  0xb4   : > { %1442 = vmatmul.mubr.bf16.gmra.mrb[12].mxu1 %v3109_v1  ;;  %1352 = vmatprep.mubr.bf16.mxu0 %v3139_v30  ;;  %v416_v31 = vrot.slane %v414_v9, 5  ;;  %v420_v32 = vshll.u32 %v3159_v61, 16  ;;  %v426_v33 = vrot.slane %v424_v56, 4  ;;  %v430_v35 = vshll.u32 %v232_v25, 16 }
  0xb5   : > { %1449 = vmatprep.mubr.bf16.mxu1 %v3115_v7  ;;  %2205 = vmatpush3.bf16.msra.mxu0 %v2543_v10  ;;  %v409_v22 = vsel %vm2988_vm5, %v404_v24, %v408_v13  ;;  %v506_v42 = vsel %vm2977_vm4, %v1944_v20, %v505_v14  ;;  %v509_v43 = vsel %vm2977_vm4, %v507_v27, %v508_v29  ;;  %v512_v54 = vrot.slane %v3159_v61, 5  ;;  %v2550_v61 = vld [vmem:[#allocation4 + $0x200] sm:$0xff]   ;;  %v2551_v10 = vld [vmem:[#allocation4 + $0x208] sm:$0xff]   ;;  %v2558_v27 = vld [vmem:[#allocation4 + $0x238] sm:$0xff]  }
  0xb6   : > { %2269 = vmatpush3.bf16.msra.mxu1 %v2544_v18  ;;  %v3192_v36 = vcombine.low %v399_v23, %v409_v22  ;;  %v417_v37 = vor.u32 %v416_v31, %v413_v21  ;;  %v422_v38 = vrot.slane %v420_v32, 5  ;;  %v432_v50 = vrot.slane %v430_v35, 5  ;;  %2206 = vmatprep.subr.bf16.mxu0 %v2546_v40  ;;  %v235_v21 = vld [vmem:[%s2925_s8 + $0x68] sm:$0xf]  ;;  %v3252_v23 = vld [vmem:[%s2925_s8 + $0x6c] sm:$0xf] }
  0xb7   : > { %v1945_v59 = vrot.slane %v3155_v53, 9  ;;  %2270 = vmatprep.subr.bf16.mxu1 %v2547_v46  ;;  %v3208_v62 = vcombine.low %v506_v42, %v509_v43  ;;  %v515_v2 = vrot.slane %v232_v25, 5  ;;  %v3214_v4 = vcombine.low %v3195_v39, %v3203_v44  ;;  %v3255_v24 = vld [vmem:[%s2925_s8 + $0x70] sm:$0xf]  ;;  %v238_v46 = vld [vmem:[%s2925_s8 + $0x74] sm:$0xf] }
  0xb8   : > { %v418_v48 = vrot.slane %v417_v37, 4  ;;  %v427_v49 = vor.u32 %v426_v33, %v422_v38  ;;  %v514_v5 = vrot.slane %v512_v54, 4  ;;  %v531_v12 = vshrl.u32 %v3203_v44, 16  ;;  %s2054_s8 = sshll.u32 %s2732_s16, 5  ;;  %s1822_s16 = sshll.u32 %s2923_s23, 4  ;;  %s3423_s16 = int_to_ptr.vmem [resolvable:$true] %s1822_s16 }
  0xb9   : > { %2207 = vmatpush3.bf16.msra.mxu0 %v2548_v57  ;;  %v513_v8 = vsel %vm2977_vm4, %v1945_v59, %v512_v54  ;;  %v527_v13 = vshll.u32 %v3203_v44, 16  ;;  %v537_v31 = vshll.u32 %v235_v21, 16  ;;  %v552_v32 = vshrl.u32 %v3252_v23, 16  ;;  %s3405_s20 = sadd.s32 %s2063_s21, %s2054_s8  ;;  %s2644_s6 = scalar_lea.vmem %s3423_s16, 2048 }
  0xba   : > { %v423_v63 = vsel %vm2988_vm5, %v418_v48, %v422_v38  ;;  %v428_v0 = vrot.slane %v427_v49, 4  ;;  %2271 = vmatpush3.bf16.msra.mxu1 %v2549_v60  ;;  %2336 = vmatprep.subr.bf16.mxu0 %v2550_v61  ;;  %v516_v9 = vsel %vm2977_vm4, %v514_v5, %v515_v2  ;;  %v533_v20 = vrot.slane %v531_v12, 4  ;;  %s2055_s15 = sshll.u32 %s3405_s20, 7  ;;  %p2645_p12 = scmp.ne.s32.totalorder %s3423_s16, %s2644_s6 }
  0xbb   : > { %1353 = vmatmul.mubr.bf16.gmra.mrb[16].mxu0 %v3081_v28  ;;  %2368 = vmatprep.subr.bf16.mxu1 %v2550_v61  ;;  %v3228_v56 = vcombine.low %v513_v8, %v516_v9  ;;  %v529_v18 = vrot.slane %v527_v13, 5  ;;  %v555_v33 = vshll.u32 %v3252_v23, 16  ;;  %v561_v35 = vshll.u32 %v3255_v24, 16  ;;  %s3421_s4 = scalar_lea.hbm %s3488_s3, %s2055_s15  ;;  %p2651_p11 = scmp.lt.s32.totalorder %s3423_s16, %s2649_s28 }
  0xbc   : > { %1450 = vmatmul.mubr.bf16.gmra.mrb[16].mxu1 %v3141_v34  ;;  %1360 = vmatprep.mubr.bf16.mxu0 %v3168_v3  ;;  %v433_v53 = vsel %vm2988_vm5, %v428_v0, %v432_v50  ;;  %v539_v37 = vrot.slane %v537_v31, 5  ;;  %v554_v38 = vrot.slane %v552_v32, 4  ;;  %v546_v49 = vrot.slane %v3203_v44, 5  ;;  %p2646_p7 = pnand %p2645_p12, %p3519_p5  ;;  %p2652_p13 = scmp.lt.s32.totalorder %s2650_s1, %s2644_s6 }
  0xbd   : > { %1457 = vmatprep.mubr.bf16.mxu1 %v3149_v45  ;;  %v3218_v6 = vcombine.low %v423_v63, %v433_v53  ;;  %v534_v25 = vor.u32 %v533_v20, %v529_v18  ;;  %v557_v40 = vrot.slane %v555_v33, 5  ;;  %v563_v42 = vrot.slane %v561_v35, 5 }
  0xbe   : > { %v571_v59 = vshll.u32 %v238_v46, 16  ;;  %v549_v63 = vrot.slane %v235_v21, 5  ;;  %v580_v58 = vrot.slane %v3255_v24, 5  ;;  %p2647_p9 = pneg %p2646_p7  ;;  %p2653_p1 = por %p2652_p13, %p2651_p11 }
  0xbf   : > { %v535_v22 = vrot.slane %v534_v25, 4  ;;  %v558_v54 = vor.u32 %v557_v40, %v554_v38 }
  0xc0   : > { %v573_v5 = vrot.slane %v571_v59, 5  ;;  %p2654_p4 = pnand %p2653_p1, %p2647_p9 }
  0xc1   : > { %v540_v50 = vsel %vm2988_vm5, %v535_v22, %v539_v37  ;;  %v559_v0 = vrot.slane %v558_v54, 4 }
  0xc3   : > { %1361 = vmatmul.mubr.bf16.gmra.mrb[20].mxu0 %v3115_v7 }
  0xc4   : > { %1458 = vmatmul.mubr.bf16.gmra.mrb[20].mxu1 %v3177_v15  ;;  %1368 = vmatprep.mubr.bf16.mxu0 %v3192_v36 }
  0xc5   : > { %1465 = vmatprep.mubr.bf16.mxu1 %v3181_v19 }
  0xcb   : > { %1369 = vmatmul.mubr.bf16.gmra.mrb[24].mxu0 %v3149_v45 }
  0xcc   : > { %1466 = vmatmul.mubr.bf16.gmra.mrb[24].mxu1 %v3208_v62  ;;  %1376 = vmatprep.mubr.bf16.mxu0 %v3218_v6 }
  0xcd   : > { %1473 = vmatprep.mubr.bf16.mxu1 %v3214_v4 }
  0xd3   : > { %1377 = vmatmul.mubr.bf16.gmra.mrb[28].mxu0 %v3181_v19 }
  0xd4   : > { %1474 = vmatmul.mubr.bf16.gmra.mrb[28].mxu1 %v3228_v56  ;;  %1514 = vmatprep.mubr.bf16.mxu0 %v3040_v47  ;;  %v2553_v47 = vld [vmem:[#allocation4 + $0x218] sm:$0xff]  }
  0xd5   : > { %1611 = vmatprep.mubr.bf16.mxu1 %v3071_v16 }
  0xdb   : > { %1515 = vmatmul.mubr.bf16.vlgmr.msra.gmra.mrb[32].mxu0 %v3030_v41  ;;  %v2555_v41 = vld [vmem:[#allocation4 + $0x228] sm:$0xff]  }
  0xdc   : > { %1612 = vmatmul.mubr.bf16.vlgmr.msra.gmra.mrb[32].mxu1 %v3018_v26  ;;  %2337 = vmatpush3.bf16.msra.mxu0 %v2550_v61  ;;  %v2554_v26 = vld [vmem:[#allocation4 + $0x220] sm:$0xff]  }
  0xdd   : > { %2376 = vmatpush3.bf16.msra.mxu1 %v2550_v61  ;;  %1522 = vmatprep.mubr.bf16.mxu0 %v3073_v17 }
  0xde   : > { %1619 = vmatprep.mubr.bf16.mxu1 %v3099_v51  ;;  %2338 = vmatprep.subr.bf16.mxu0 %v2551_v10 }
  0xdf   : > { %2369 = vmatprep.subr.bf16.mxu1 %v2551_v10 }
  0xe0   : > { %2339 = vmatpush3.bf16.msra.mxu0 %v2551_v10 }
  0xe1   : > { %2377 = vmatpush3.bf16.msra.mxu1 %v2551_v10  ;;  %2340 = vmatprep.subr.bf16.mxu0 %v2552_v11  ;;  %v582_v10 = vrot.slane %v580_v58, 4 }
  0xe2   : > { %2370 = vmatprep.subr.bf16.mxu1 %v2552_v11 }
  0xe3   : > { %1523 = vmatmul.mubr.bf16.gmra.mrb[36].mxu0 %v3071_v16  ;;  %v521_v16 = vshll.u32 %v3195_v39, 16 }
  0xe4   : > { %1620 = vmatmul.mubr.bf16.gmra.mrb[36].mxu1 %v3048_v55  ;;  %1530 = vmatprep.mubr.bf16.mxu0 %v3109_v1  ;;  %v518_v55 = vshrl.u32 %v3195_v39, 16 }
  0xe5   : > { %1627 = vmatprep.mubr.bf16.mxu1 %v3139_v30  ;;  %2341 = vmatpush3.bf16.msra.mxu0 %v2552_v11  ;;  %v523_v14 = vrot.slane %v521_v16, 5 }
  0xe6   : > { %2378 = vmatpush3.bf16.msra.mxu1 %v2552_v11  ;;  %2342 = vmatprep.subr.bf16.mxu0 %v2553_v47  ;;  %v583_v11 = vrot.slane %v238_v46, 5 }
  0xe7   : > { %2371 = vmatprep.subr.bf16.mxu1 %v2553_v47 }
  0xe9   : > { %2343 = vmatpush3.bf16.msra.mxu0 %v2553_v47 }
  0xea   : > { %2379 = vmatpush3.bf16.msra.mxu1 %v2553_v47  ;;  %2344 = vmatprep.subr.bf16.mxu0 %v2554_v26 }
  0xeb   : > { %2372 = vmatprep.subr.bf16.mxu1 %v2554_v26  ;;  %1531 = vmatmul.mubr.bf16.gmra.mrb[40].mxu0 %v3099_v51  ;;  %v520_v51 = vrot.slane %v518_v55, 4 }
  0xec   : > { %1628 = vmatmul.mubr.bf16.gmra.mrb[40].mxu1 %v3081_v28  ;;  %1538 = vmatprep.mubr.bf16.mxu0 %v3141_v34  ;;  %v2556_v28 = vld [vmem:[#allocation4 + $0x230] sm:$0xff]  }
  0xed   : > { %1635 = vmatprep.mubr.bf16.mxu1 %v3168_v3  ;;  %2345 = vmatpush3.bf16.msra.mxu0 %v2554_v26  ;;  %v524_v29 = vor.u32 %v523_v14, %v520_v51 }
  0xee   : > { %2380 = vmatpush3.bf16.msra.mxu1 %v2554_v26  ;;  %2346 = vmatprep.subr.bf16.mxu0 %v2555_v41 }
  0xef   : > { %2373 = vmatprep.subr.bf16.mxu1 %v2555_v41 }
  0xf1   : > { %2347 = vmatpush3.bf16.msra.mxu0 %v2555_v41 }
  0xf2   : > { %2381 = vmatpush3.bf16.msra.mxu1 %v2555_v41  ;;  %2348 = vmatprep.subr.bf16.mxu0 %v2556_v28 }
  0xf3   : > { %2374 = vmatprep.subr.bf16.mxu1 %v2556_v28  ;;  %1539 = vmatmul.mubr.bf16.gmra.mrb[44].mxu0 %v3139_v30  ;;  %v565_v30 = vshrl.u32 %v3255_v24, 16 }
  0xf4   : > { %1636 = vmatmul.mubr.bf16.gmra.mrb[44].mxu1 %v3115_v7  ;;  %1546 = vmatprep.mubr.bf16.mxu0 %v3177_v15  ;;  %v525_v7 = vrot.slane %v524_v29, 4 }
  0xf5   : > { %1643 = vmatprep.mubr.bf16.mxu1 %v3192_v36  ;;  %2349 = vmatpush3.bf16.msra.mxu0 %v2556_v28  ;;  %v567_v43 = vrot.slane %v565_v30, 4 }
  0xf6   : > { %2382 = vmatpush3.bf16.msra.mxu1 %v2556_v28  ;;  %2350 = vmatprep.subr.bf16.mxu0 %v2558_v27  ;;  %v530_v48 = vsel %vm2988_vm5, %v525_v7, %v529_v18 }
  0xf7   : > { %2375 = vmatprep.subr.bf16.mxu1 %v2558_v27  ;;  %v568_v57 = vor.u32 %v567_v43, %v563_v42  ;;  %v1973_v60 = vcombine.low %v530_v48, %v540_v50 }
  0xf9   : > { %2351 = vmatpush3.bf16.msra.mxu0 %v2558_v27  ;;  %v569_v2 = vrot.slane %v568_v57, 4 }
  0xfa   : > { %2383 = vmatpush3.bf16.msra.mxu1 %v2558_v27 }
  0xfb   : > { %1547 = vmatmul.mubr.bf16.gmra.mrb[48].mxu0 %v3168_v3  ;;  %v1946_v3 = vrot.slane %v3195_v39, 9  ;;  %v564_v39 = vsel %vm2988_vm5, %v559_v0, %v563_v42  ;;  %v574_v53 = vsel %vm2988_vm5, %v569_v2, %v573_v5 }
  0xfc   : > { %1644 = vmatmul.mubr.bf16.gmra.mrb[48].mxu1 %v3149_v45  ;;  %1554 = vmatprep.mubr.bf16.mxu0 %v3208_v62  ;;  %v548_v45 = vrot.slane %v546_v49, 4  ;;  %v1976_v9 = vcombine.low %v564_v39, %v574_v53 }
  0xfd   : > { %1651 = vmatprep.mubr.bf16.mxu1 %v3218_v6  ;;  %v547_v44 = vsel %vm2977_vm4, %v1946_v3, %v546_v49 }
  0xfe   : > { %v550_v61 = vsel %vm2977_vm4, %v548_v45, %v549_v63 }
  0xff   : > { %v1974_v8 = vcombine.low %v547_v44, %v550_v61 }
 0x103   : > { %1555 = vmatmul.mubr.bf16.gmra.mrb[52].mxu0 %v3192_v36  ;;  %v1947_v36 = vrot.slane %v3252_v23, 9 }
 0x104   : > { %1652 = vmatmul.mubr.bf16.gmra.mrb[52].mxu1 %v3181_v19  ;;  %1562 = vmatprep.mubr.bf16.mxu0 %v3228_v56  ;;  %v1975_v19 = vcombine.low %v3252_v23, %v3255_v24 }
 0x105   : > { %1659 = vmatprep.mubr.bf16.mxu1 %v1973_v60 }
 0x10b   : > { %1563 = vmatmul.mubr.bf16.gmra.mrb[56].mxu0 %v3218_v6 }
 0x10c   : > { %1660 = vmatmul.mubr.bf16.gmra.mrb[56].mxu1 %v3214_v4  ;;  %1570 = vmatprep.mubr.bf16.mxu0 %v1974_v8  ;;  %v581_v4 = vsel %vm2977_vm4, %v1947_v36, %v580_v58 }
 0x10d   : > { %1667 = vmatprep.mubr.bf16.mxu1 %v1976_v9 }
 0x113   : > { %1571 = vmatmul.mubr.bf16.gmra.mrb[60].mxu0 %v1973_v60 }
 0x114   : > { %1668 = vmatmul.mubr.bf16.gmra.mrb[60].mxu1 %v1975_v19  ;;  %2352 = vmatprep.mubr.bf16.mxu0 %v3073_v17  ;;  %v584_v17 = vsel %vm2977_vm4, %v582_v10, %v583_v11 }
 0x115   : > { %2360 = vmatprep.mubr.bf16.mxu1 %v3208_v62  ;;  %v1977_v62 = vcombine.low %v581_v4, %v584_v17 }
 0x11b   : > { %2353 = vmatmul.mubr.bf16.vlgmr.msra.gmra.mrb[64].mxu0 %v3109_v1  ;;  %v3306_v1 = vld [vmem:[%s3487_s2] ss:$0 sm:$0xff] }
 0x11c   : > { %2361 = vmatmul.mubr.bf16.vlgmr.msra.gmra.mrb[64].mxu1 %v3228_v56  ;;  %2356 = vmatprep.mubr.bf16.mxu0 %v3141_v34 }
 0x11d   : > { %2364 = vmatprep.mubr.bf16.mxu1 %v1974_v8 }
 0x123   : > { %2357 = vmatmul.mubr.bf16.gmra.mrb[68].mxu0 %v3177_v15 }
 0x124   : > { %2365 = vmatmul.mubr.bf16.gmra.mrb[68].mxu1 %v1977_v62 }
 0x16e   : > { %v2080_v6 = vpop.f32.mrb[0].mxu0 }
 0x16f   : > { %v2144_v47 = vpop.f32.mrb[0].mxu1  ;;  %v2081_v56 = vpop.f32.mrb[1].mxu0 }
 0x170   : > { %v2145_v34 = vpop.f32.mrb[1].mxu1  ;;  %v2082_v26 = vadd.f32 %v2081_v56, %v2080_v6  ;;  %v2083_v55 = vpop.f32.mrb[2].mxu0 }
 0x171   : > { %v2146_v41 = vadd.f32 %v2145_v34, %v2144_v47  ;;  %v2147_v16 = vpop.f32.mrb[2].mxu1  ;;  %v2084_v12 = vpop.f32.mrb[3].mxu0 }
 0x172   : > { %v2148_v52 = vpop.f32.mrb[3].mxu1  ;;  %v1323_v13 = vadd.f32 %v2082_v26, %v3306_v1  ;;  %v2085_v28 = vadd.f32 %v2084_v12, %v2083_v55 }
 0x173   : > { %v2149_v15 = vadd.f32 %v2148_v52, %v2147_v16 }
 0x174   : > { %v3309_v51 = vadd.f32 %v2146_v41, %v1323_v13  ;;  %v1326_v14 = vadd.f32 %v2085_v28, %v3306_v1 }
 0x176   : > { %v3312_v18 = vadd.f32 %v2149_v15, %v1326_v14  ;;  %v2086_v20 = vpop.f32.mrb[4].mxu0 }
 0x177   : > { %v2150_v21 = vpop.f32.mrb[4].mxu1  ;;  %v2087_v23 = vpop.f32.mrb[5].mxu0 }
 0x178   : > { %v2151_v24 = vpop.f32.mrb[5].mxu1  ;;  %v2088_v27 = vadd.f32 %v2087_v23, %v2086_v20  ;;  %v2089_v25 = vpop.f32.mrb[6].mxu0 }
 0x179   : > { %v2152_v29 = vadd.f32 %v2151_v24, %v2150_v21  ;;  %v2153_v31 = vpop.f32.mrb[6].mxu1  ;;  %v2090_v32 = vpop.f32.mrb[7].mxu0 }
 0x17a   : > { %v2154_v33 = vpop.f32.mrb[7].mxu1  ;;  %v1331_v35 = vadd.f32 %v2088_v27, %v3306_v1  ;;  %v2091_v30 = vadd.f32 %v2090_v32, %v2089_v25 }
 0x17b   : > { %v2155_v7 = vadd.f32 %v2154_v33, %v2153_v31 }
 0x17c   : > { %v3315_v22 = vadd.f32 %v2152_v29, %v1331_v35  ;;  %v1334_v37 = vadd.f32 %v2091_v30, %v3306_v1 }
 0x17e   : > { %v3318_v38 = vadd.f32 %v2155_v7, %v1334_v37  ;;  %v2092_v40 = vpop.f32.mrb[8].mxu0 }
 0x17f   : > { %v2156_v42 = vpop.f32.mrb[8].mxu1  ;;  %v2093_v43 = vpop.f32.mrb[9].mxu0 }
 0x180   : > { %v2157_v46 = vpop.f32.mrb[9].mxu1  ;;  %v2094_v48 = vadd.f32 %v2093_v43, %v2092_v40  ;;  %v2095_v50 = vpop.f32.mrb[10].mxu0 }
 0x181   : > { %v2158_v49 = vadd.f32 %v2157_v46, %v2156_v42  ;;  %v2159_v54 = vpop.f32.mrb[10].mxu1  ;;  %v2096_v57 = vpop.f32.mrb[11].mxu0 }
 0x182   : > { %v2160_v59 = vpop.f32.mrb[11].mxu1  ;;  %v1339_v60 = vadd.f32 %v2094_v48, %v3306_v1  ;;  %v2097_v3 = vadd.f32 %v2096_v57, %v2095_v50 }
 0x183   : > { %v2161_v63 = vadd.f32 %v2160_v59, %v2159_v54 }
 0x184   : > { %v3321_v45 = vadd.f32 %v2158_v49, %v1339_v60  ;;  %v1342_v0 = vadd.f32 %v2097_v3, %v3306_v1 }
 0x186   : > { %v3324_v2 = vadd.f32 %v2161_v63, %v1342_v0  ;;  %v2098_v5 = vpop.f32.mrb[12].mxu0 }
 0x187   : > { %v2162_v44 = vpop.f32.mrb[12].mxu1  ;;  %v2099_v61 = vpop.f32.mrb[13].mxu0 }
 0x188   : > { %v2163_v39 = vpop.f32.mrb[13].mxu1  ;;  %v2100_v53 = vadd.f32 %v2099_v61, %v2098_v5  ;;  %v2101_v9 = vpop.f32.mrb[14].mxu0 }
 0x189   : > { %v2164_v8 = vadd.f32 %v2163_v39, %v2162_v44  ;;  %v2165_v19 = vpop.f32.mrb[14].mxu1  ;;  %v2102_v58 = vpop.f32.mrb[15].mxu0 }
 0x18a   : > { %v2166_v36 = vpop.f32.mrb[15].mxu1  ;;  %v1347_v10 = vadd.f32 %v2100_v53, %v3306_v1  ;;  %v2103_v11 = vadd.f32 %v2102_v58, %v2101_v9 }
 0x18b   : > { %v2167_v4 = vadd.f32 %v2166_v36, %v2165_v19 }
 0x18c   : > { %v3327_v17 = vadd.f32 %v2164_v8, %v1347_v10  ;;  %v1350_v62 = vadd.f32 %v2103_v11, %v3306_v1 }
 0x18e   : > { %v3330_v6 = vadd.f32 %v2167_v4, %v1350_v62  ;;  %v2104_v47 = vpop.f32.mrb[16].mxu0 }
 0x18f   : > { %v2168_v56 = vpop.f32.mrb[16].mxu1  ;;  %v2105_v34 = vpop.f32.mrb[17].mxu0 }
 0x190   : > { %v2169_v26 = vpop.f32.mrb[17].mxu1  ;;  %v2106_v41 = vadd.f32 %v2105_v34, %v2104_v47  ;;  %v2107_v16 = vpop.f32.mrb[18].mxu0 }
 0x191   : > { %v2170_v55 = vadd.f32 %v2169_v26, %v2168_v56  ;;  %v2171_v12 = vpop.f32.mrb[18].mxu1  ;;  %v2108_v52 = vpop.f32.mrb[19].mxu0 }
 0x192   : > { %v2172_v13 = vpop.f32.mrb[19].mxu1  ;;  %v1355_v28 = vadd.f32 %v2106_v41, %v3306_v1  ;;  %v2109_v15 = vadd.f32 %v2108_v52, %v2107_v16 }
 0x193   : > { %v2173_v14 = vadd.f32 %v2172_v13, %v2171_v12 }
 0x194   : > { %v3333_v20 = vadd.f32 %v2170_v55, %v1355_v28  ;;  %v1358_v21 = vadd.f32 %v2109_v15, %v3306_v1 }
 0x196   : > { %v3336_v23 = vadd.f32 %v2173_v14, %v1358_v21  ;;  %v2110_v24 = vpop.f32.mrb[20].mxu0 }
 0x197   : > { %v2174_v27 = vpop.f32.mrb[20].mxu1  ;;  %v2111_v29 = vpop.f32.mrb[21].mxu0 }
 0x198   : > { %v2175_v25 = vpop.f32.mrb[21].mxu1  ;;  %v2112_v31 = vadd.f32 %v2111_v29, %v2110_v24  ;;  %v2113_v33 = vpop.f32.mrb[22].mxu0 }
 0x199   : > { %v2176_v32 = vadd.f32 %v2175_v25, %v2174_v27  ;;  %v2177_v35 = vpop.f32.mrb[22].mxu1  ;;  %v2114_v30 = vpop.f32.mrb[23].mxu0 }
 0x19a   : > { %v2178_v7 = vpop.f32.mrb[23].mxu1  ;;  %v1363_v37 = vadd.f32 %v2112_v31, %v3306_v1  ;;  %v2115_v40 = vadd.f32 %v2114_v30, %v2113_v33 }
 0x19b   : > { %v2179_v42 = vadd.f32 %v2178_v7, %v2177_v35 }
 0x19c   : > { %v3339_v43 = vadd.f32 %v2176_v32, %v1363_v37  ;;  %v1366_v46 = vadd.f32 %v2115_v40, %v3306_v1 }
 0x19e   : > { %v3342_v48 = vadd.f32 %v2179_v42, %v1366_v46  ;;  %v2116_v49 = vpop.f32.mrb[24].mxu0 }
 0x19f   : > { %v2180_v50 = vpop.f32.mrb[24].mxu1  ;;  %v2117_v54 = vpop.f32.mrb[25].mxu0 }
 0x1a0   : > { %v2181_v57 = vpop.f32.mrb[25].mxu1  ;;  %v2118_v59 = vadd.f32 %v2117_v54, %v2116_v49  ;;  %v2119_v3 = vpop.f32.mrb[26].mxu0 }
 0x1a1   : > { %v2182_v60 = vadd.f32 %v2181_v57, %v2180_v50  ;;  %v2183_v63 = vpop.f32.mrb[26].mxu1  ;;  %v2120_v0 = vpop.f32.mrb[27].mxu0 }
 0x1a2   : > { %v2184_v5 = vpop.f32.mrb[27].mxu1  ;;  %v1371_v44 = vadd.f32 %v2118_v59, %v3306_v1  ;;  %v2121_v61 = vadd.f32 %v2120_v0, %v2119_v3 }
 0x1a3   : > { %v2185_v39 = vadd.f32 %v2184_v5, %v2183_v63 }
 0x1a4   : > { %v3345_v53 = vadd.f32 %v2182_v60, %v1371_v44  ;;  %v1374_v8 = vadd.f32 %v2121_v61, %v3306_v1 }
 0x1a6   : > { %v3348_v9 = vadd.f32 %v2185_v39, %v1374_v8  ;;  %v2122_v19 = vpop.f32.mrb[28].mxu0 }
 0x1a7   : > { %v2186_v58 = vpop.f32.mrb[28].mxu1  ;;  %v2123_v36 = vpop.f32.mrb[29].mxu0 }
 0x1a8   : > { %v2187_v10 = vpop.f32.mrb[29].mxu1  ;;  %v2124_v11 = vadd.f32 %v2123_v36, %v2122_v19  ;;  %v2125_v62 = vpop.f32.mrb[30].mxu0 }
 0x1a9   : > { %v2188_v4 = vadd.f32 %v2187_v10, %v2186_v58  ;;  %v2189_v47 = vpop.f32.mrb[30].mxu1  ;;  %v2126_v56 = vpop.f32.mrb[31].mxu0 }
 0x1aa   : > { %v2190_v34 = vpop.f32.mrb[31].mxu1  ;;  %v1379_v26 = vadd.f32 %v2124_v11, %v3306_v1  ;;  %v2127_v41 = vadd.f32 %v2126_v56, %v2125_v62 }
 0x1ab   : > { %v2191_v55 = vadd.f32 %v2190_v34, %v2189_v47 }
 0x1ac   : > { %v3351_v16 = vadd.f32 %v2188_v4, %v1379_v26  ;;  %v1382_v12 = vadd.f32 %v2127_v41, %v3306_v1 }
 0x1ae   : > { %v3354_v52 = vadd.f32 %v2191_v55, %v1382_v12  ;;  %v2208_v13 = vpop.f32.mrb[32].mxu0 }
 0x1af   : > { %v2272_v28 = vpop.f32.mrb[32].mxu1  ;;  %v2209_v15 = vpop.f32.mrb[33].mxu0 }
 0x1b0   : > { %v2273_v14 = vpop.f32.mrb[33].mxu1  ;;  %v2210_v21 = vadd.f32 %v2209_v15, %v2208_v13  ;;  %v2211_v27 = vpop.f32.mrb[34].mxu0 }
 0x1b1   : > { %v2274_v24 = vadd.f32 %v2273_v14, %v2272_v28  ;;  %v2275_v29 = vpop.f32.mrb[34].mxu1  ;;  %v2212_v25 = vpop.f32.mrb[35].mxu0 }
 0x1b2   : > { %v2276_v31 = vpop.f32.mrb[35].mxu1  ;;  %v1517_v32 = vadd.f32 %v2210_v21, %v3309_v51  ;;  %v2213_v33 = vadd.f32 %v2212_v25, %v2211_v27 }
 0x1b3   : > { %v2277_v35 = vadd.f32 %v2276_v31, %v2275_v29 }
 0x1b4   : > { %v1520_v30 = vadd.f32 %v2213_v33, %v3312_v18  ;;  %v3358_v7 = vadd.f32 %v2274_v24, %v1517_v32 }
 0x1b6   : > { %v2214_v1 = vpop.f32.mrb[36].mxu0  ;;  %v3360_v40 = vadd.f32 %v2277_v35, %v1520_v30 }
 0x1b7   : > { %v2278_v37 = vpop.f32.mrb[36].mxu1  ;;  %v2215_v42 = vpop.f32.mrb[37].mxu0 }
 0x1b8   : > { %v2279_v46 = vpop.f32.mrb[37].mxu1  ;;  %v2216_v49 = vadd.f32 %v2215_v42, %v2214_v1  ;;  %v2217_v54 = vpop.f32.mrb[38].mxu0 }
 0x1b9   : > { %v2280_v50 = vadd.f32 %v2279_v46, %v2278_v37  ;;  %v2281_v57 = vpop.f32.mrb[38].mxu1  ;;  %v2218_v59 = vpop.f32.mrb[39].mxu0 }
 0x1ba   : > { %v2282_v60 = vpop.f32.mrb[39].mxu1  ;;  %v1525_v51 = vadd.f32 %v2216_v49, %v3315_v22  ;;  %v2219_v3 = vadd.f32 %v2218_v59, %v2217_v54 }
 0x1bb   : > { %v2283_v63 = vadd.f32 %v2282_v60, %v2281_v57 }
 0x1bc   : > { %v1528_v18 = vadd.f32 %v2219_v3, %v3318_v38  ;;  %v3364_v0 = vadd.f32 %v2280_v50, %v1525_v51 }
 0x1be   : > { %v2220_v5 = vpop.f32.mrb[40].mxu0  ;;  %v3366_v61 = vadd.f32 %v2283_v63, %v1528_v18 }
 0x1bf   : > { %v2284_v44 = vpop.f32.mrb[40].mxu1  ;;  %v2221_v39 = vpop.f32.mrb[41].mxu0 }
 0x1c0   : > { %v2285_v8 = vpop.f32.mrb[41].mxu1  ;;  %v2222_v19 = vadd.f32 %v2221_v39, %v2220_v5  ;;  %v2223_v36 = vpop.f32.mrb[42].mxu0 }
 0x1c1   : > { %v2286_v58 = vadd.f32 %v2285_v8, %v2284_v44  ;;  %v2287_v10 = vpop.f32.mrb[42].mxu1  ;;  %v2224_v11 = vpop.f32.mrb[43].mxu0 }
 0x1c2   : > { %v2288_v4 = vpop.f32.mrb[43].mxu1  ;;  %v1533_v22 = vadd.f32 %v2222_v19, %v3321_v45  ;;  %v2225_v62 = vadd.f32 %v2224_v11, %v2223_v36 }
 0x1c3   : > { %v2289_v47 = vadd.f32 %v2288_v4, %v2287_v10 }
 0x1c4   : > { %v1536_v38 = vadd.f32 %v2225_v62, %v3324_v2  ;;  %v3370_v56 = vadd.f32 %v2286_v58, %v1533_v22 }
 0x1c6   : > { %v2226_v34 = vpop.f32.mrb[44].mxu0  ;;  %v3372_v41 = vadd.f32 %v2289_v47, %v1536_v38 }
 0x1c7   : > { %v2290_v26 = vpop.f32.mrb[44].mxu1  ;;  %v2227_v55 = vpop.f32.mrb[45].mxu0 }
 0x1c8   : > { %v2291_v12 = vpop.f32.mrb[45].mxu1  ;;  %v2228_v13 = vadd.f32 %v2227_v55, %v2226_v34  ;;  %v2229_v15 = vpop.f32.mrb[46].mxu0 }
 0x1c9   : > { %v2292_v28 = vadd.f32 %v2291_v12, %v2290_v26  ;;  %v2293_v14 = vpop.f32.mrb[46].mxu1  ;;  %v2230_v21 = vpop.f32.mrb[47].mxu0 }
 0x1ca   : > { %v2294_v24 = vpop.f32.mrb[47].mxu1  ;;  %v1541_v45 = vadd.f32 %v2228_v13, %v3327_v17  ;;  %v2231_v27 = vadd.f32 %v2230_v21, %v2229_v15 }
 0x1cb   : > { %v2295_v29 = vadd.f32 %v2294_v24, %v2293_v14 }
 0x1cc   : > { %v1544_v2 = vadd.f32 %v2231_v27, %v3330_v6  ;;  %v3376_v25 = vadd.f32 %v2292_v28, %v1541_v45 }
 0x1ce   : > { %v2232_v31 = vpop.f32.mrb[48].mxu0  ;;  %v3378_v33 = vadd.f32 %v2295_v29, %v1544_v2 }
 0x1cf   : > { %v2296_v32 = vpop.f32.mrb[48].mxu1  ;;  %v2233_v35 = vpop.f32.mrb[49].mxu0 }
 0x1d0   : > { %v2297_v30 = vpop.f32.mrb[49].mxu1  ;;  %v2234_v1 = vadd.f32 %v2233_v35, %v2232_v31  ;;  %v2235_v42 = vpop.f32.mrb[50].mxu0 }
 0x1d1   : > { %v2298_v37 = vadd.f32 %v2297_v30, %v2296_v32  ;;  %v2299_v46 = vpop.f32.mrb[50].mxu1  ;;  %v2236_v49 = vpop.f32.mrb[51].mxu0 }
 0x1d2   : > { %v2300_v50 = vpop.f32.mrb[51].mxu1  ;;  %v1549_v17 = vadd.f32 %v2234_v1, %v3333_v20  ;;  %v2237_v54 = vadd.f32 %v2236_v49, %v2235_v42 }
 0x1d3   : > { %v2301_v57 = vadd.f32 %v2300_v50, %v2299_v46 }
 0x1d4   : > { %v1552_v6 = vadd.f32 %v2237_v54, %v3336_v23  ;;  %v1646_v59 = vadd.f32 %v2298_v37, %v1549_v17 }
 0x1d6   : > { %v2238_v60 = vpop.f32.mrb[52].mxu0  ;;  %v3382_v3 = vadd.f32 %v2301_v57, %v1552_v6 }
 0x1d7   : > { %v2302_v51 = vpop.f32.mrb[52].mxu1  ;;  %v2239_v63 = vpop.f32.mrb[53].mxu0 }
 0x1d8   : > { %v2303_v18 = vpop.f32.mrb[53].mxu1  ;;  %v2240_v5 = vadd.f32 %v2239_v63, %v2238_v60  ;;  %v2241_v39 = vpop.f32.mrb[54].mxu0 }
 0x1d9   : > { %v2304_v44 = vadd.f32 %v2303_v18, %v2302_v51  ;;  %v2305_v8 = vpop.f32.mrb[54].mxu1  ;;  %v2242_v19 = vpop.f32.mrb[55].mxu0 }
 0x1da   : > { %v2306_v58 = vpop.f32.mrb[55].mxu1  ;;  %v1557_v36 = vadd.f32 %v2240_v5, %v3339_v43  ;;  %v2243_v20 = vadd.f32 %v2242_v19, %v2241_v39 }
 0x1db   : > { %v2307_v10 = vadd.f32 %v2306_v58, %v2305_v8 }
 0x1dc   : > { %v1560_v11 = vadd.f32 %v2243_v20, %v3342_v48  ;;  %v1654_v23 = vadd.f32 %v2304_v44, %v1557_v36 }
 0x1de   : > { %v2244_v4 = vpop.f32.mrb[56].mxu0  ;;  %v1657_v62 = vadd.f32 %v2307_v10, %v1560_v11 }
 0x1df   : > { %v2308_v22 = vpop.f32.mrb[56].mxu1  ;;  %v2245_v47 = vpop.f32.mrb[57].mxu0 }
 0x1e0   : > { %v2309_v38 = vpop.f32.mrb[57].mxu1  ;;  %v2246_v34 = vadd.f32 %v2245_v47, %v2244_v4  ;;  %v2247_v55 = vpop.f32.mrb[58].mxu0 }
 0x1e1   : > { %v2310_v26 = vadd.f32 %v2309_v38, %v2308_v22  ;;  %v2311_v12 = vpop.f32.mrb[58].mxu1  ;;  %v2248_v13 = vpop.f32.mrb[59].mxu0 }
 0x1e2   : > { %v2312_v28 = vpop.f32.mrb[59].mxu1  ;;  %v1565_v15 = vadd.f32 %v2246_v34, %v3345_v53  ;;  %v2249_v14 = vadd.f32 %v2248_v13, %v2247_v55 }
 0x1e3   : > { %v2313_v43 = vadd.f32 %v2312_v28, %v2311_v12 }
 0x1e4   : > { %v1568_v21 = vadd.f32 %v2249_v14, %v3348_v9  ;;  %v1662_v24 = vadd.f32 %v2310_v26, %v1565_v15 }
 0x1e6   : > { %v2250_v48 = vpop.f32.mrb[60].mxu0  ;;  %v3388_v27 = vadd.f32 %v2313_v43, %v1568_v21 }
 0x1e7   : > { %v2314_v45 = vpop.f32.mrb[60].mxu1  ;;  %v2251_v29 = vpop.f32.mrb[61].mxu0 }
 0x1e8   : > { %v2315_v2 = vpop.f32.mrb[61].mxu1  ;;  %v2252_v31 = vadd.f32 %v2251_v29, %v2250_v48  ;;  %v2253_v35 = vpop.f32.mrb[62].mxu0 }
 0x1e9   : > { %v2316_v32 = vadd.f32 %v2315_v2, %v2314_v45  ;;  %v2317_v30 = vpop.f32.mrb[62].mxu1  ;;  %v2254_v1 = vpop.f32.mrb[63].mxu0 }
 0x1ea   : > { %v2318_v37 = vpop.f32.mrb[63].mxu1  ;;  %v1573_v42 = vadd.f32 %v2252_v31, %v3351_v16  ;;  %v2255_v53 = vadd.f32 %v2254_v1, %v2253_v35 }
 0x1eb   : > { %v2319_v46 = vadd.f32 %v2318_v37, %v2317_v30 }
 0x1ec   : > { %v1576_v49 = vadd.f32 %v2255_v53, %v3354_v52  ;;  %v1670_v9 = vadd.f32 %v2316_v32, %v1573_v42 }
 0x1ee   : > { %v2354_v50 = vpop.f32.mrb[64].mxu0  ;;  %v1673_v54 = vadd.f32 %v2319_v46, %v1576_v49 }
 0x1ef   : > { %v2362_v17 = vpop.f32.mrb[64].mxu1  ;;  %v1719_v57 = vadd.f32 %v2354_v50, %v3364_v0  ;;  %v1710_v60 = vpop.f32.mrb[65].mxu0 }
 0x1f0   : > { %v1751_v6 = vadd.f32 %v2362_v17, %v1654_v23  ;;  %v1742_v51 = vpop.f32.mrb[65].mxu1  ;;  %v1711_v63 = vadd.f32 %v1710_v60, %v3358_v7  ;;  %v2355_v16 = vpop.f32.mrb[66].mxu0 }
 0x1f1   : > { %v1743_v18 = vadd.f32 %v1742_v51, %v1646_v59  ;;  %v2363_v5 = vpop.f32.mrb[66].mxu1  ;;  %v1775_v44 = vmax.f32 %v1719_v57, 0.0  ;;  %v1722_v39 = vadd.f32 %v2355_v16, %v3366_v61  ;;  %v1713_v0 = vpop.f32.mrb[67].mxu0 }
 0x1f2   : > { %v1783_v52 = vmax.f32 %v1751_v6, 0.0  ;;  %v1754_v8 = vadd.f32 %v2363_v5, %v1657_v62  ;;  %v1745_v19 = vpop.f32.mrb[67].mxu1  ;;  %v1773_v58 = vmax.f32 %v1711_v63, 0.0  ;;  %v1714_v7 = vadd.f32 %v1713_v0, %v3360_v40 }
 0x1f3   : > { %v1781_v36 = vmax.f32 %v1743_v18, 0.0  ;;  %v1746_v59 = vadd.f32 %v1745_v19, %v3382_v3  ;;  %1791 = vst [vmem:[%s2923_s23 + $0x10] sm:$0xff] %v1775_v44  ;;  %v1776_v20 = vmax.f32 %v1722_v39, 0.0 }
 0x1f4   : > { %1799 = vst [vmem:[%s2923_s23 + $0x50] sm:$0xff] %v1783_v52  ;;  %v1784_v10 = vmax.f32 %v1754_v8, 0.0  ;;  %1789 = vst [vmem:[%s2923_s23] sm:$0xff] %v1773_v58  ;;  %v1774_v61 = vmax.f32 %v1714_v7, 0.0 }
 0x1f5   : > { %1797 = vst [vmem:[%s2923_s23 + $0x40] sm:$0xff] %v1781_v36  ;;  %v1782_v11 = vmax.f32 %v1746_v59, 0.0  ;;  %1792 = vst [vmem:[%s2923_s23 + $0x18] sm:$0xff] %v1776_v20 }
 0x1f6   : > { %1800 = vst [vmem:[%s2923_s23 + $0x58] sm:$0xff] %v1784_v10  ;;  %1790 = vst [vmem:[%s2923_s23 + $0x8] sm:$0xff] %v1774_v61  ;;  %v2358_v40 = vpop.f32.mrb[68].mxu0 }
 0x1f7   : > { %1798 = vst [vmem:[%s2923_s23 + $0x48] sm:$0xff] %v1782_v11  ;;  %v2366_v3 = vpop.f32.mrb[68].mxu1  ;;  %v1735_v23 = vadd.f32 %v2358_v40, %v3376_v25  ;;  %v1726_v22 = vpop.f32.mrb[69].mxu0 }
 0x1f8   : > { %v1767_v4 = vadd.f32 %v2366_v3, %v1670_v9  ;;  %v1758_v62 = vpop.f32.mrb[69].mxu1  ;;  %v1727_v47 = vadd.f32 %v1726_v22, %v3370_v56  ;;  %v2359_v34 = vpop.f32.mrb[70].mxu0 }
 0x1f9   : > { %v1759_v38 = vadd.f32 %v1758_v62, %v1662_v24  ;;  %v2367_v26 = vpop.f32.mrb[70].mxu1  ;;  %v1779_v55 = vmax.f32 %v1735_v23, 0.0  ;;  %v1738_v13 = vadd.f32 %v2359_v34, %v3378_v33  ;;  %v1729_v25 = vpop.f32.mrb[71].mxu0 }
 0x1fa   : > { %v1787_v12 = vmax.f32 %v1767_v4, 0.0  ;;  %v1770_v28 = vadd.f32 %v2367_v26, %v1673_v54  ;;  %v1761_v15 = vpop.f32.mrb[71].mxu1  ;;  %v1777_v14 = vmax.f32 %v1727_v47, 0.0  ;;  %v1730_v43 = vadd.f32 %v1729_v25, %v3372_v41 }
 0x1fb   : > { %v1785_v56 = vmax.f32 %v1759_v38, 0.0  ;;  %v1762_v21 = vadd.f32 %v1761_v15, %v3388_v27  ;;  %1795 = vst [vmem:[%s2923_s23 + $0x30] sm:$0xff] %v1779_v55  ;;  %v1780_v24 = vmax.f32 %v1738_v13, 0.0 }
 0x1fc   : > { %1803 = vst [vmem:[%s2923_s23 + $0x70] sm:$0xff] %v1787_v12  ;;  %v1788_v48 = vmax.f32 %v1770_v28, 0.0  ;;  %1793 = vst [vmem:[%s2923_s23 + $0x20] sm:$0xff] %v1777_v14  ;;  %v1778_v41 = vmax.f32 %v1730_v43, 0.0 }
 0x1fd   : > { %1801 = vst [vmem:[%s2923_s23 + $0x60] sm:$0xff] %v1785_v56  ;;  %v1786_v33 = vmax.f32 %v1762_v21, 0.0  ;;  %1796 = vst [vmem:[%s2923_s23 + $0x38] sm:$0xff] %v1780_v24 }
 0x1fe   : > { %1804 = vst [vmem:[%s2923_s23 + $0x78] sm:$0xff] %v1788_v48  ;;  %1794 = vst [vmem:[%s2923_s23 + $0x28] sm:$0xff] %v1778_v41 }
 0x1ff   : > { %1802 = vst [vmem:[%s2923_s23 + $0x68] sm:$0xff] %v1786_v33 }
 0x200   : > { %2657 = shalt.err (!%p2654_p4)
}
 0x201   : > { %s2658_s23 = scalar_lea.hbm %s3421_s4, 2048  ;;  %s2662_s29 = scalar_lea.hbm %s3488_s3, 8192 }
 0x202   : > { %p2659_p8 = scmp.ne.s32.totalorder %s3421_s4, %s2658_s23  ;;  %p2663_p3 = scmp.lt.u32.totalorder %s3421_s4, %s3488_s3 }
 0x203   : > { %p2664_p2 = scmp.lt.u32.totalorder %s2662_s29, %s2658_s23  ;;  %p2666_p12 = scmp.lt.u32.totalorder %s2658_s23, %s3421_s4 }
 0x204   : > { %p2660_p10 = pnand %p2659_p8, %p3519_p5 }
 0x205   : > { %p2665_p6 = por %p2664_p2, %p2663_p3 }
 0x206   : > { %p2661_p0 = pneg %p2660_p10 }
 0x207   : > { %p2667_p7 = por %p2666_p12, %p2665_p6 }
 0x209   : > { %p2668_p9 = pnand %p2667_p7, %p2661_p0 }
 0x20b   : > { %2671 = shalt.err (!%p2668_p9)
}
 0x20c   : > { %s2751_s21 = smov 128   ;;  %s2752_s8 = smov 8  }
 0x20d   : > { %2392 = dma.vmem_to_hbm [thread:$0]  (%p3519_p5), %s3423_s16, 2048, %s3421_s4, %s3433_s25, %s2751_s21, %s2751_s21, %s2752_s8  }
 0x20e PF: > { %p2406_p11 = scmp.ge.s32.totalorder %s2744_s19, 2  ;;  %s1837_s20 = sand.u32 1, %s2716_s12  }
 0x20f   : > { %p3520_p13 = scmp.ne.s32.totalorder %s3504_s27, 0  ;;  %s1838_s15 = scalar_lea.sflag [#allocation6], %s1837_s20 }
 0x211   : > { %p2399_p1 = pnand %p2406_p11, %p3520_p13 }
 0x213   : > { %2711 = dma.done.wait (!%p2399_p1), %s1838_s15, 2048  }
 0x214   : > { %2713 = vsyncadd (!%p2399_p1), %s1838_s15, 4294965248  ;;  %s17_s19 = sadd.s32 1, %s2744_s19   ;;  %s3521_s16 = sld [smem:[#allocation17_spill]] }
 0x215   : > { %p14_p4 = scmp.ge.s32.totalorder %s17_s19, 6   ;;  %s3522_s26 = sld [smem:[#allocation18_spill]] }
 0x216   : > { %s3523_s18 = sld [smem:[#allocation19_spill]]  ;;  %s3524_s12 = smov %s2720_s13 }
 0x217   : > { %s3525_s13 = smov %s2724_s14  ;;  %s3526_s14 = smov %s2852_s5 }
 0x218   : > { %s3527_s15 = smov %s2736_s17  ;;  %16 = sbr.rel (!%p14_p4) target bundleno = 8 (0x8), region = 88 }
 0x21b   : > { %s3528_s17 = smov %s3522_s26 }
 0x21f   :  { %1843 = vsyncpa [#allocation5], 1 }
 0x220   :  { %1845 = vsyncpa [#allocation5 + $0x1], 1 }
 0x221   :  { %1846 = vsyncpa [#allocation6], 1 }
 0x222   :  { %1848 = vsyncpa [#allocation6 + $0x1], 1 }
 0x223   :  { %1849 = vsyncmov [#allocation3] }
 0x226   :  { %s1850_s27 = vpop.sfrf %1849 }
 0x227   :  { %p2058_p5 = scmp.ne.s32.totalorder %s1850_s27, 0 }
 0x229   :  { %1854 = shalt.err (%p2058_p5)  }
 0x22a   :  { %1856 = vsyncmov [#allocation3 + $0x1] }
 0x22d   :  { %s1857_s5 = vpop.sfrf %1856 }
 0x22e   :  { %p2059_p8 = scmp.ne.s32.totalorder %s1857_s5, 0 }
 0x230   :  { %1861 = shalt.err (%p2059_p8)  }

</bundles_post_ra>
